<compile_context>
chip_gen: v5e
topology: v5e:2x2
jax: 0.10.0
libtpu: 0.0.40
codegen_flags: <defaults>
</compile_context>

<pallas_src>
import jax
import jax.numpy as jnp
from jax.experimental import pallas as pl
from jax.experimental.pallas import tpu as pltpu

FEAT_DIM = 512
LANE = 128


def _round_up(x, m):
    return ((x + m - 1) // m) * m


def _aclip_kernel(x_ref, wenc_ref, benc_ref,
                  wmask_ref, bmask_ref,
                  wcls_ref, bcls_ref,
                  out_ref, acc_ref):
    """Grid = (M blocks, K blocks); K is the encoder reduction axis.

    x_ref    : (bm, tk)          bf16
    wenc_ref : (tk, FEAT_DIM)    bf16
    benc_ref : (1, FEAT_DIM)     f32
    wmask_ref: (FEAT_DIM, FEAT)  bf16
    bmask_ref: (1, FEAT_DIM)     f32
    wcls_ref : (FEAT_DIM, N_pad) bf16 (zero-padded past num_classes)
    bcls_ref : (1, N_pad)        f32  (zero-padded past num_classes)
    out_ref  : (bm, N_pad)       f32
    acc_ref  : (bm, FEAT_DIM)    f32 VMEM scratch (encoder accumulator)
    """
    k = pl.program_id(1)

    @pl.when(k == 0)
    def _():
        acc_ref[...] = jnp.zeros_like(acc_ref)

    # --- frozen encoder stand-in: K-tiled bf16 matmul, f32 accumulation -----
    acc_ref[...] += jnp.dot(x_ref[...], wenc_ref[...],
                            preferred_element_type=jnp.float32)

    @pl.when(k == pl.num_programs(1) - 1)
    def _():
        # Bias added once in the finalize branch only (mirrors `.float()`).
        feats = acc_ref[...] + benc_ref[...]

        # mask head: sigmoid(Linear(512, 512)(features)); bf16 MXU matmul,
        # f32 accumulation, sigmoid in f32 (EUP).
        mask_logits = (jnp.dot(feats.astype(jnp.bfloat16), wmask_ref[...],
                               preferred_element_type=jnp.float32)
                       + bmask_ref[...])
        mymask = jax.nn.sigmoid(mask_logits)

        # gating in f32.
        gated = mymask * feats

        # classifier: Linear(512, num_classes) padded to lane-dense N_pad.
        out_ref[...] = (jnp.dot(gated.astype(jnp.bfloat16), wcls_ref[...],
                                preferred_element_type=jnp.float32)
                        + bcls_ref[...]).astype(out_ref.dtype)


def aclip_classify(x_nchw, params, *, tk=256):
    """x_nchw: [B, C, H, W] float32. Returns [B, num_classes] float32."""
    w_enc, b_enc, w_mask, b_mask, w_cls, b_cls = params
    B = x_nchw.shape[0]
    in_dim, feat = w_enc.shape
    num_classes = w_cls.shape[1]
    assert feat == FEAT_DIM

    x_flat = x_nchw.reshape(B, -1).astype(jnp.float32)
    assert x_flat.shape[1] == in_dim

    # --- padding for MXU / lane friendliness ---------------------------------
    bm = 128 if B >= 128 else _round_up(B, 16)      # sublane-friendly M tile
    B_pad = _round_up(B, bm)
    K_pad = _round_up(in_dim, tk)                   # zero-padded reduction dim
    N_pad = _round_up(num_classes, LANE)            # lane-dense classifier out

    x_p = jnp.zeros((B_pad, K_pad), jnp.bfloat16)
    x_p = x_p.at[:B, :in_dim].set(x_flat.astype(jnp.bfloat16))
    w_enc_p = jnp.zeros((K_pad, FEAT_DIM), jnp.bfloat16)
    w_enc_p = w_enc_p.at[:in_dim, :].set(w_enc.astype(jnp.bfloat16))
    w_mask_b = w_mask.astype(jnp.bfloat16)
    w_cls_p = jnp.zeros((FEAT_DIM, N_pad), jnp.bfloat16)
    w_cls_p = w_cls_p.at[:, :num_classes].set(w_cls.astype(jnp.bfloat16))
    b_cls_p = jnp.zeros((1, N_pad), jnp.float32)
    b_cls_p = b_cls_p.at[:, :num_classes].set(b_cls)

    grid = (B_pad // bm, K_pad // tk)

    # Explicit scoped-VMEM budget: double-buffered input/output tiles + scratch
    # (+ headroom), clamped into [16 MiB, 32 MiB] so it is safe on v5e/v6e/v7x.
    tile_bytes = 2 * (bm * tk * 2 + tk * FEAT_DIM * 2
                      + FEAT_DIM * FEAT_DIM * 2 + FEAT_DIM * N_pad * 2
                      + 2 * FEAT_DIM * 4 + N_pad * 4 + bm * N_pad * 4)
    vmem_limit = int(min(max(tile_bytes + bm * FEAT_DIM * 4 + (4 << 20),
                             16 << 20), 32 << 20))

    out = pl.pallas_call(
        _aclip_kernel,
        out_shape=jax.ShapeDtypeStruct((B_pad, N_pad), jnp.float32),
        grid_spec=pltpu.PrefetchScalarGridSpec(
            num_scalar_prefetch=0,
            grid=grid,
            in_specs=[
                pl.BlockSpec((bm, tk), lambda i, k: (i, k)),              # x
                pl.BlockSpec((tk, FEAT_DIM), lambda i, k: (k, 0)),        # w_enc
                pl.BlockSpec((1, FEAT_DIM), lambda i, k: (0, 0)),         # b_enc
                pl.BlockSpec((FEAT_DIM, FEAT_DIM), lambda i, k: (0, 0)),  # w_mask
                pl.BlockSpec((1, FEAT_DIM), lambda i, k: (0, 0)),         # b_mask
                pl.BlockSpec((FEAT_DIM, N_pad), lambda i, k: (0, 0)),     # w_cls
                pl.BlockSpec((1, N_pad), lambda i, k: (0, 0)),            # b_cls
            ],
            out_specs=pl.BlockSpec((bm, N_pad), lambda i, k: (i, 0)),
            scratch_shapes=[pltpu.VMEM((bm, FEAT_DIM), jnp.float32)],
        ),
        compiler_params=pltpu.CompilerParams(
            dimension_semantics=("parallel", "arbitrary"),
            vmem_limit_bytes=vmem_limit,
        ),
    )(x_p, w_enc_p, b_enc, w_mask_b, b_mask, w_cls_p, b_cls_p)

    # Drop the padded batch rows and the zero-padded class lanes.
    return out[:B, :num_classes]


def init_params(key, in_dim, num_classes):
    k = jax.random.split(key, 6)
    scale_enc = 1.0 / jnp.sqrt(in_dim)
    scale_mask = 1.0 / jnp.sqrt(FEAT_DIM)
    scale_cls = 1.0 / jnp.sqrt(FEAT_DIM)
    w_enc = jax.random.uniform(k[0], (in_dim, FEAT_DIM), jnp.float32,
                               -scale_enc, scale_enc)
    b_enc = jax.random.uniform(k[1], (1, FEAT_DIM), jnp.float32,
                               -scale_enc, scale_enc)
    w_mask = jax.random.uniform(k[2], (FEAT_DIM, FEAT_DIM), jnp.float32,
                                -scale_mask, scale_mask)
    b_mask = jax.random.uniform(k[3], (1, FEAT_DIM), jnp.float32,
                                -scale_mask, scale_mask)
    w_cls = jax.random.uniform(k[4], (FEAT_DIM, num_classes), jnp.float32,
                               -scale_cls, scale_cls)
    b_cls = jax.random.uniform(k[5], (1, num_classes), jnp.float32,
                               -scale_cls, scale_cls)
    return (w_enc, b_enc, w_mask, b_mask, w_cls, b_cls)


def _reference(x_nchw, params):
    """Plain-JAX reference with the same mixed precision (bf16 matmul inputs,
    f32 accumulation, f32 sigmoid/gating) as the kernel."""
    w_enc, b_enc, w_mask, b_mask, w_cls, b_cls = params
    x_flat = x_nchw.reshape(x_nchw.shape[0], -1).astype(jnp.float32)
    feats = jnp.dot(x_flat.astype(jnp.bfloat16), w_enc.astype(jnp.bfloat16),
                    preferred_element_type=jnp.float32) + b_enc
    mymask = jax.nn.sigmoid(
        jnp.dot(feats.astype(jnp.bfloat16), w_mask.astype(jnp.bfloat16),
                preferred_element_type=jnp.float32) + b_mask)
    gated = mymask * feats
    return (jnp.dot(gated.astype(jnp.bfloat16), w_cls.astype(jnp.bfloat16),
                    preferred_element_type=jnp.float32) + b_cls)


if __name__ == "__main__":
    key = jax.random.PRNGKey(0)
    k_x, k_p = jax.random.split(key)

    B, C, H, W = 2, 4, 16, 16          # image input, NCHW
    num_classes = 10
    in_dim = C * H * W                  # 1024, lane-aligned (multiple of 128)

    x = jax.random.normal(k_x, (B, C, H, W), jnp.float32)
    params = init_params(k_p, in_dim, num_classes)

    out = jax.block_until_ready(aclip_classify(x, params))
    ref = _reference(x, params)

    assert out.shape == (B, num_classes)
    assert jnp.allclose(out, ref, atol=1e-2, rtol=1e-2), "mismatch vs reference"

    print("KERNEL_OK")
</pallas_src>

<mosaic_0001>
module attributes {stable_mosaic.version = 11 : i64} {
  func.func @_aclip_kernel(%arg0: i32, %arg1: i32, %arg2: memref<16x256xbf16, #tpu.memory_space<vmem>>, %arg3: memref<256x512xbf16, #tpu.memory_space<vmem>>, %arg4: memref<1x512xf32, #tpu.memory_space<vmem>>, %arg5: memref<512x512xbf16, #tpu.memory_space<vmem>>, %arg6: memref<1x512xf32, #tpu.memory_space<vmem>>, %arg7: memref<512x128xbf16, #tpu.memory_space<vmem>>, %arg8: memref<1x128xf32, #tpu.memory_space<vmem>>, %arg9: memref<16x128xf32, #tpu.memory_space<vmem>>, %arg10: memref<16x512xf32, #tpu.memory_space<vmem>>) attributes {dimension_semantics = [#tpu.dimension_semantics<parallel>, #tpu.dimension_semantics<arbitrary>], iteration_bounds = array<i64: 1, 4>, scalar_prefetch = 0 : i64, scratch_operands = 1 : i64, tpu.core_type = #tpu.core_type<tc>, window_params = [{transform_indices = @transform_0, window_bounds = array<i64: 16, 256>}, {transform_indices = @transform_1, window_bounds = array<i64: 256, 512>}, {pipeline_mode = #tpu.pipeline_mode<synchronous>, transform_indices = @transform_2, window_bounds = array<i64: 1, 512>}, {pipeline_mode = #tpu.pipeline_mode<synchronous>, transform_indices = @transform_3, window_bounds = array<i64: 512, 512>}, {pipeline_mode = #tpu.pipeline_mode<synchronous>, transform_indices = @transform_4, window_bounds = array<i64: 1, 512>}, {pipeline_mode = #tpu.pipeline_mode<synchronous>, transform_indices = @transform_5, window_bounds = array<i64: 512, 128>}, {pipeline_mode = #tpu.pipeline_mode<synchronous>, transform_indices = @transform_6, window_bounds = array<i64: 1, 128>}, {transform_indices = @transform_7, window_bounds = array<i64: 16, 128>}]} {
    %c0_i32 = arith.constant 0 : i32
    %0 = arith.cmpi eq, %arg1, %c0_i32 : i32
    %1 = arith.extui %0 : i1 to i32
    %c0_i32_0 = arith.constant 0 : i32
    %2 = arith.cmpi ne, %1, %c0_i32_0 : i32
    scf.if %2 {
      %cst_9 = arith.constant 0.000000e+00 : f32
      %12 = vector.broadcast %cst_9 : f32 to vector<16x512xf32>
      %c0_10 = arith.constant 0 : index
      %c0_11 = arith.constant 0 : index
      %13 = vector.load %arg10[%c0_10, %c0_11] : memref<16x512xf32, #tpu.memory_space<vmem>>, vector<16x512xf32>
      tpu.vector_store %arg10[%c0_10, %c0_11], %12 {strides = array<i32>} : memref<16x512xf32, #tpu.memory_space<vmem>>, vector<16x512xf32>,
    } else {
    }
    %c0 = arith.constant 0 : index
    %c0_1 = arith.constant 0 : index
    %3 = vector.load %arg10[%c0, %c0_1] : memref<16x512xf32, #tpu.memory_space<vmem>>, vector<16x512xf32>
    %c0_2 = arith.constant 0 : index
    %c0_3 = arith.constant 0 : index
    %4 = vector.load %arg2[%c0_2, %c0_3] : memref<16x256xbf16, #tpu.memory_space<vmem>>, vector<16x256xbf16>
    %c0_4 = arith.constant 0 : index
    %c0_5 = arith.constant 0 : index
    %5 = vector.load %arg3[%c0_4, %c0_5] : memref<256x512xbf16, #tpu.memory_space<vmem>>, vector<256x512xbf16>
    %cst = arith.constant dense<0.000000e+00> : vector<16x512xf32>
    %6 = tpu.matmul %4, %5, %cst {dimension_numbers = #tpu.dot_dimension_numbers<[1], [0], [0], [1], [0, 0, 1, 1], [], []>} : vector<16x256xbf16>, vector<256x512xbf16>, vector<16x512xf32> -> vector<16x512xf32>
    %7 = arith.addf %3, %6 : vector<16x512xf32>
    %c0_6 = arith.constant 0 : index
    %c0_7 = arith.constant 0 : index
    %8 = vector.load %arg10[%c0_6, %c0_7] : memref<16x512xf32, #tpu.memory_space<vmem>>, vector<16x512xf32>
    tpu.vector_store %arg10[%c0_6, %c0_7], %7 {strides = array<i32>} : memref<16x512xf32, #tpu.memory_space<vmem>>, vector<16x512xf32>,
    %c3_i32 = arith.constant 3 : i32
    %9 = arith.cmpi eq, %arg1, %c3_i32 : i32
    %10 = arith.extui %9 : i1 to i32
    %c0_i32_8 = arith.constant 0 : i32
    %11 = arith.cmpi ne, %10, %c0_i32_8 : i32
    scf.if %11 {
      %c0_9 = arith.constant 0 : index
      %c0_10 = arith.constant 0 : index
      %12 = vector.load %arg10[%c0_9, %c0_10] : memref<16x512xf32, #tpu.memory_space<vmem>>, vector<16x512xf32>
      %c0_11 = arith.constant 0 : index
      %c0_12 = arith.constant 0 : index
      %13 = vector.load %arg4[%c0_11, %c0_12] : memref<1x512xf32, #tpu.memory_space<vmem>>, vector<1x512xf32>
      %14 = vector.broadcast %13 : vector<1x512xf32> to vector<16x512xf32>
      %15 = arith.addf %12, %14 : vector<16x512xf32>
      %16 = arith.truncf %15 : vector<16x512xf32> to vector<16x512xbf16>
      %c0_13 = arith.constant 0 : index
      %c0_14 = arith.constant 0 : index
      %17 = vector.load %arg5[%c0_13, %c0_14] : memref<512x512xbf16, #tpu.memory_space<vmem>>, vector<512x512xbf16>
      %cst_15 = arith.constant dense<0.000000e+00> : vector<16x512xf32>
      %18 = tpu.matmul %16, %17, %cst_15 {dimension_numbers = #tpu.dot_dimension_numbers<[1], [0], [0], [1], [0, 0, 1, 1], [], []>} : vector<16x512xbf16>, vector<512x512xbf16>, vector<16x512xf32> -> vector<16x512xf32>
      %c0_16 = arith.constant 0 : index
      %c0_17 = arith.constant 0 : index
      %19 = vector.load %arg6[%c0_16, %c0_17] : memref<1x512xf32, #tpu.memory_space<vmem>>, vector<1x512xf32>
      %20 = vector.broadcast %19 : vector<1x512xf32> to vector<16x512xf32>
      %21 = arith.addf %18, %20 : vector<16x512xf32>
      %22 = arith.negf %21 : vector<16x512xf32>
      %23 = math.exp %22 : vector<16x512xf32>
      %cst_18 = arith.constant 1.000000e+00 : f32
      %24 = vector.broadcast %cst_18 : f32 to vector<16x512xf32>
      %25 = arith.addf %24, %23 : vector<16x512xf32>
      %26 = arith.divf %24, %25 : vector<16x512xf32>
      %27 = arith.mulf %26, %15 : vector<16x512xf32>
      %28 = arith.truncf %27 : vector<16x512xf32> to vector<16x512xbf16>
      %c0_19 = arith.constant 0 : index
      %c0_20 = arith.constant 0 : index
      %29 = vector.load %arg7[%c0_19, %c0_20] : memref<512x128xbf16, #tpu.memory_space<vmem>>, vector<512x128xbf16>
      %cst_21 = arith.constant dense<0.000000e+00> : vector<16x128xf32>
      %30 = tpu.matmul %28, %29, %cst_21 {dimension_numbers = #tpu.dot_dimension_numbers<[1], [0], [0], [1], [0, 0, 1, 1], [], []>} : vector<16x512xbf16>, vector<512x128xbf16>, vector<16x128xf32> -> vector<16x128xf32>
      %c0_22 = arith.constant 0 : index
      %c0_23 = arith.constant 0 : index
      %31 = vector.load %arg8[%c0_22, %c0_23] : memref<1x128xf32, #tpu.memory_space<vmem>>, vector<1x128xf32>
      %32 = vector.broadcast %31 : vector<1x128xf32> to vector<16x128xf32>
      %33 = arith.addf %30, %32 : vector<16x128xf32>
      %c0_24 = arith.constant 0 : index
      %c0_25 = arith.constant 0 : index
      %34 = vector.load %arg9[%c0_24, %c0_25] : memref<16x128xf32, #tpu.memory_space<vmem>>, vector<16x128xf32>
      tpu.vector_store %arg9[%c0_24, %c0_25], %33 {strides = array<i32>} : memref<16x128xf32, #tpu.memory_space<vmem>>, vector<16x128xf32>,
    } else {
    }
    return
  }
  func.func @transform_0(%arg0: i32, %arg1: i32) -> (i32, i32) {
    %c0_i32 = arith.constant 0 : i32
    return %arg0, %arg1 : i32, i32
  }
  func.func @transform_1(%arg0: i32, %arg1: i32) -> (i32, i32) {
    %c0_i32 = arith.constant 0 : i32
    %c0_i32_0 = arith.constant 0 : i32
    return %arg1, %c0_i32 : i32, i32
  }
  func.func @transform_2(%arg0: i32, %arg1: i32) -> (i32, i32) {
    %c0_i32 = arith.constant 0 : i32
    %c0_i32_0 = arith.constant 0 : i32
    %c0_i32_1 = arith.constant 0 : i32
    return %c0_i32, %c0_i32_0 : i32, i32
  }
  func.func @transform_3(%arg0: i32, %arg1: i32) -> (i32, i32) {
    %c0_i32 = arith.constant 0 : i32
    %c0_i32_0 = arith.constant 0 : i32
    %c0_i32_1 = arith.constant 0 : i32
    return %c0_i32, %c0_i32_0 : i32, i32
  }
  func.func @transform_4(%arg0: i32, %arg1: i32) -> (i32, i32) {
    %c0_i32 = arith.constant 0 : i32
    %c0_i32_0 = arith.constant 0 : i32
    %c0_i32_1 = arith.constant 0 : i32
    return %c0_i32, %c0_i32_0 : i32, i32
  }
  func.func @transform_5(%arg0: i32, %arg1: i32) -> (i32, i32) {
    %c0_i32 = arith.constant 0 : i32
    %c0_i32_0 = arith.constant 0 : i32
    %c0_i32_1 = arith.constant 0 : i32
    return %c0_i32, %c0_i32_0 : i32, i32
  }
  func.func @transform_6(%arg0: i32, %arg1: i32) -> (i32, i32) {
    %c0_i32 = arith.constant 0 : i32
    %c0_i32_0 = arith.constant 0 : i32
    %c0_i32_1 = arith.constant 0 : i32
    return %c0_i32, %c0_i32_0 : i32, i32
  }
  func.func @transform_7(%arg0: i32, %arg1: i32) -> (i32, i32) {
    %c0_i32 = arith.constant 0 : i32
    %c0_i32_0 = arith.constant 0 : i32
    return %arg0, %c0_i32 : i32, i32
  }
}

</mosaic_0001>

<bundles_post_ra>
// kernel: tpu_custom_call.1
= control target key start
LH: loop header
LB: loop body
LE: loop exit
PB: predicated region body
PF: predicated region fallthrough
CT: control target
= control target key end

     0   :  { %s4693_s0 = inlined_call_operand.hbm [shape: bf16[16,1024], index: 0, kind: input, shape index: {}]   ;;  %s4694_s1 = inlined_call_operand.hbm [shape: bf16[1024,512], index: 1, kind: input, shape index: {}]   ;;  %s4695_s2 = inlined_call_operand.hbm [shape: f32[1,512], index: 2, kind: input, shape index: {}]   ;;  %s4696_s3 = inlined_call_operand.hbm [shape: bf16[512,512], index: 3, kind: input, shape index: {}]   ;;  %s4697_s4 = inlined_call_operand.hbm [shape: f32[1,512], index: 4, kind: input, shape index: {}]   ;;  %s4698_s5 = inlined_call_operand.hbm [shape: bf16[512,128], index: 5, kind: input, shape index: {}]   ;;  %s4699_s6 = inlined_call_operand.vmem [shape: f32[1,128], index: 6, kind: input, shape index: {}]   ;;  %s4700_s7 = inlined_call_operand.hbm [shape: f32[16,128], index: 7, kind: output, shape index: {}]  }
   0x1   :  { %4704 = sst [smem:[#allocation23_spill]] %s4693_s0 }
   0x2   :  { %4705 = sst [smem:[#allocation24_spill]] %s4695_s2 }
   0x3   :  { %4706 = sst [smem:[#allocation25_spill]] %s4696_s3 }
   0x4   :  { %4707 = sst [smem:[#allocation26_spill]] %s4697_s4 }
   0x5   :  { %4708 = sst [smem:[#allocation27_spill]] %s4698_s5 }
   0x6   :  { %12 = vsyncpa [#allocation4], 0 }
   0x7   :  { %14 = vsyncpa [#allocation4 + $0x1], 0 }
   0x8   :  { %15 = vsyncpa [#allocation7], 0 }
   0x9   :  { %17 = vsyncpa [#allocation7 + $0x1], 0 }
   0xa   :  { %18 = vsyncpa [#allocation10], 0 }
   0xb   :  { %19 = vsyncpa [#allocation13], 0 }
   0xc   :  { %20 = vsyncpa [#allocation5], 0  ;;  %s4273_s24 = smov 0   ;;  %s4275_s25 = smov 0  }
   0xd   :  { %s4277_s26 = smov 0   ;;  %s4279_s27 = smov 0  }
   0xe   :  { %s4281_s28 = smov 0   ;;  %s4283_s29 = smov 0  }
   0xf LB: > { %s4302_s30 = sadd.s32 4294967295, %s4216_s29   ;;  %p60_p0 = scmp.ne.s32.totalorder %s4200_s25, %s4196_s24  ;;  %s4216_s29 = sphi %s4283_s29, %s26_s29   ;;  %s4212_s28 = sphi %s4281_s28, %s4741_s28   ;;  %s4208_s27 = sphi %s4279_s27, %s4740_s27   ;;  %s4204_s26 = sphi %s4277_s26, %s4739_s26   ;;  %s4200_s25 = sphi %s4275_s25, %s4738_s25   ;;  %s4196_s24 = sphi %s4273_s24, %s4737_s24  }
  0x10   : > { %p61_p1 = scmp.eq.s32.totalorder %s4302_s30, 0  ;;  %p2620_p2 = scmp.ge.s32.totalorder %s4216_s29, 1 }
  0x11   : > { %p228_p3 = scmp.lt.s32.totalorder %s4216_s29, 5  ;;  %s4710_s2 = sld [smem:[#allocation24_spill]] }
  0x12   : > { %p4310_p4 = por %p61_p1, %p60_p0  ;;  %s4218_s13 = smov [#allocation8]  }
  0x13   : > { %p4317_p5 = pnand %p2620_p2, %p228_p3  ;;  %s242_s14 = sshll.u32 %s4218_s13, 4  ;;  %s243_s14 = int_to_ptr.vmem [resolvable:$true] %s242_s14 }
  0x14   : > { %s4712_s3 = sld [smem:[#allocation25_spill]]  ;;  %s4219_s19 = smov [#allocation9]  }
  0x15   : > { %p3811_p6 = pneg %p4317_p5  ;;  %s253_s20 = sshll.u32 %s4219_s19, 4  ;;  %s254_s20 = int_to_ptr.vmem [resolvable:$true] %s253_s20 }
  0x16   : > { %s4701_s21 = smov 256   ;;  %s4702_s22 = smov 16  }
  0x17   : > { %s240_s11 = sshll.u32 %s4710_s2, 4  ;;  %p4328_p7 = pnand %p3811_p6, %p61_p1  ;;  %s241_s11 = int_to_ptr.hbm [resolvable:$true] %s240_s11 }
  0x18   : > { %s4714_s4 = sld [smem:[#allocation26_spill]]  ;;  %s4222_s10 = smov [#allocation11]  }
  0x19   : > { %3814 = dma.hbm_to_vmem [thread:$0]  (!%p4328_p7), %s241_s11, 64, %s243_s14, [#allocation7]  }
  0x1a   : > { %s251_s17 = sshll.u32 %s4712_s3, 4  ;;  %s268_s11 = sshll.u32 %s4222_s10, 4  ;;  %s252_s17 = int_to_ptr.hbm [resolvable:$true] %s251_s17  ;;  %s269_s11 = int_to_ptr.vmem [resolvable:$true] %s268_s11 }
  0x1b   : > { %3817 = dma.hbm_to_vmem [thread:$0]  (!%p4328_p7), %s252_s17, 16384, %s254_s20, [#allocation10], %s4701_s21, %s4701_s21, %s4702_s22  }
  0x1c   : > { %s4715_s5 = sld [smem:[#allocation27_spill]]  ;;  %s4223_s16 = smov [#allocation12]  }
  0x1d   : > { %s279_s17 = sshll.u32 %s4223_s16, 4  ;;  %s4224_s19 = smov 64   ;;  %s280_s17 = int_to_ptr.vmem [resolvable:$true] %s279_s17 }
  0x1e   : > { %s266_s9 = sshll.u32 %s4714_s4, 4  ;;  %s4225_s20 = smov 4   ;;  %s267_s9 = int_to_ptr.hbm [resolvable:$true] %s266_s9 }
  0x1f   : > { %3820 = dma.hbm_to_vmem [thread:$0]  (!%p4328_p7), %s267_s9, 64, %s269_s11, [#allocation10]  }
  0x20   : > { %s35_s23 = sadd.s32 1, %s4212_s28  ;;  %s47_s24 = sadd.s32 1, %s4204_s26 }
  0x21   : > { %p36_p8 = scmp.ge.s32.totalorder %s35_s23, 4  ;;  %p54_p9 = scmp.ne.s32.totalorder %s4204_s26, %s4200_s25 }
  0x22   : > { %s277_s15 = sshll.u32 %s4715_s5, 4  ;;  %p55_p10 = scmp.eq.s32.totalorder %s4216_s29, 0  ;;  %s278_s15 = int_to_ptr.hbm [resolvable:$true] %s277_s15 }
  0x23   : > { %3823 = dma.hbm_to_vmem [thread:$0]  (!%p4328_p7), %s278_s15, 4096, %s280_s17, [#allocation13], %s4224_s19, %s4224_s19, %s4225_s20  }
  0x24   : > { %p3835_p11 = scmp.lt.s32.totalorder %s4216_s29, 4  ;;  %s4743_s23 = smov (%p36_p8, %s35_s23), 0 }
  0x25   : > { %4716 = sst [smem:[#allocation21_spill]] %s4743_s23  ;;  %p4357_p12 = por %p55_p10, %p54_p9 }
  0x26   : > { %s296_s10 = sand.u32 1, %s4204_s26   ;;  %s43_s11 = ssub.s32 %s4212_s28, %s4743_s23 }
  0x27   : > { %p45_p13 = scmp.eq.s32.totalorder %s43_s11, 0  ;;  %s2626_s18 = sshll.u32 %s296_s10, 4 }
  0x28   : > { %s3558_s13 = sshll.u32 %s4212_s28, 3  ;;  %s4719_s0 = sld [smem:[#allocation23_spill]] }
  0x29   : > { %s4366_s14 = scalar_select %p45_p13, %s4204_s26, %s47_s24  }
  0x2a   : > { %s300_s19 = scalar_lea.vmem [#allocation3], %s2626_s18  ;;  %p4375_p0 = pnand %p3835_p11, %p4357_p12 }
  0x2b   : > { %4718 = sst [smem:[#allocation22_spill]] %s4366_s14  ;;  %s311_s20 = sshll.u32 %s300_s19, 4  ;;  %s312_s20 = int_to_ptr.vmem [resolvable:$true] %s311_s20 }
  0x2c   : > { %s297_s11 = scalar_lea.sflag [#allocation4], %s296_s10  ;;  %s4226_s24 = smov 512  }
  0x2d   : > { %s4227_s2 = smov 128   ;;  %s4228_s3 = smov 8  }
  0x2e   : > { %s308_s17 = scalar_lea.hbm %s4719_s0, %s3558_s13  ;;  %s321_s13 = sand.u32 1, %s4216_s29  }
  0x2f   : > { %s309_s21 = sshll.u32 %s308_s17, 4  ;;  %s2629_s18 = sshll.u32 %s296_s10, 9  ;;  %s310_s21 = int_to_ptr.hbm [resolvable:$true] %s309_s21 }
  0x30   : > { %3827 = dma.hbm_to_vmem [thread:$0]  (!%p4375_p0), %s310_s21, 256, %s312_s20, %s297_s11, %s4226_s24, %s4227_s2, %s4228_s3  }
  0x31   : > { %s3560_s15 = sshll.u32 %s4212_s28, 9  ;;  %s325_s16 = scalar_lea.vmem [#allocation6], %s2629_s18 }
  0x32   : > { %s334_s17 = sshll.u32 %s325_s16, 4  ;;  %s331_s0 = scalar_lea.hbm %s4694_s1, %s3560_s15  ;;  %s335_s17 = int_to_ptr.vmem [resolvable:$true] %s334_s17 }
  0x33   : > { %s332_s4 = sshll.u32 %s331_s0, 4  ;;  %s322_s5 = scalar_lea.sflag [#allocation7], %s321_s13  ;;  %s333_s4 = int_to_ptr.hbm [resolvable:$true] %s332_s4 }
  0x34   : > { %s4721_s23 = smov 16   ;;  %s4722_s14 = smov 256  }
  0x35   : > { %3830 = dma.hbm_to_vmem [thread:$0]  (!%p4375_p0), %s333_s4, 8192, %s335_s17, %s322_s5, %s4722_s14, %s4722_s14, %s4721_s23  }
  0x36   : > { %346 = sbr.rel (%p4317_p5) target bundleno = 755 (0x2f3), region = 48  ;;  %s348_s2 = sand.u32 (!%p4317_p5), 1, %s4200_s25  }
  0x37   : > { %s2634_s3 = sshll.u32 (!%p4317_p5), %s348_s2, 4  ;;  %s349_s21 = scalar_lea.sflag (!%p4317_p5), [#allocation4], %s348_s2 }
  0x38   : > { %s4394_s10 = scalar_lea.vmem (!%p4317_p5), [#allocation3], %s2634_s3 }
  0x3b   : > { %4171 = dma.done.wait (%p4310_p4), %s349_s21, 256  }
  0x3c   : > { %4173 = vsyncadd (%p4310_p4), %s349_s21, 4294967040  ;;  %s358_s0 = sand.u32 1, %s4302_s30   ;;  %s2635_s22 = sshll.u32 %s348_s2, 9 }
  0x3d   : > { %s359_s4 = scalar_lea.sflag [#allocation7], %s358_s0  ;;  %s4401_s5 = scalar_lea.vmem [#allocation6], %s2635_s22 }
  0x3e   : > { %4175 = dma.done.wait (%p4310_p4), %s359_s4, 8192  }
  0x3f   : > { %4177 = vsyncadd (%p4310_p4), %s359_s4, 4294959104 }
  0x40   : > { %4179 = dma.done.wait (%p61_p1), [#allocation7], 64  }
  0x41   : > { %4181 = vsyncadd (%p61_p1), [#allocation7], 4294967232 }
  0x42   : > { %4183 = dma.done.wait (%p61_p1), [#allocation10], 16448  }
  0x43   : > { %4185 = vsyncadd (%p61_p1), [#allocation10], 4294950848 }
  0x44   : > { %4187 = dma.done.wait (%p61_p1), [#allocation13], 4096  }
  0x45   : > { %4189 = vsyncadd (%p61_p1), [#allocation13], 4294963200  ;;  %p2640_p2 = scmp.ne.s32.totalorder %s4208_s27, 0 }
  0x47   : > { %421 = sbr.rel (%p2640_p2) target bundleno = 85 (0x55), region = 76 }
  0x4c   : > { %v4229_v0 = vmov 0.0  }
  0x4d   : > { %422 = vst [vmem:[#allocation2 + $0x30] sm:$0xff] %v4229_v0 }
  0x4e   : > { %423 = vst [vmem:[#allocation2] sm:$0xff] %v4229_v0 }
  0x4f   : > { %424 = vst [vmem:[#allocation2 + $0x18] sm:$0xff] %v4229_v0 }
  0x50   : > { %425 = vst [vmem:[#allocation2 + $0x10] sm:$0xff] %v4229_v0 }
  0x51   : > { %426 = vst [vmem:[#allocation2 + $0x8] sm:$0xff] %v4229_v0 }
  0x52   : > { %427 = vst [vmem:[#allocation2 + $0x20] sm:$0xff] %v4229_v0 }
  0x53   : > { %428 = vst [vmem:[#allocation2 + $0x28] sm:$0xff] %v4229_v0 }
  0x54   : > { %429 = vst [vmem:[#allocation2 + $0x38] sm:$0xff] %v4229_v0 }
  0x55 PF: > { %v2763_v1 = vld [vmem:[%s4401_s5 + $0xe0] sm:$0xf]  ;;  %v3593_v2 = vld [vmem:[%s4401_s5 + $0xec] sm:$0xf0]  ;;  %v3591_v6 = vld [vmem:[%s4401_s5 + $0xe4] sm:$0xf] }
  0x56   : > { %v2891_v3 = vld [vmem:[%s4401_s5 + $0x1e0] sm:$0xf]  ;;  %v2764_v4 = vor.u32 %v3593_v2, %v2763_v1  ;;  %v3625_v5 = vld [vmem:[%s4401_s5 + $0x1ec] sm:$0xf0]  ;;  %v2765_v7 = vld [vmem:[%s4401_s5 + $0xf0] sm:$0xf0] }
  0x57   : > { %v2892_v8 = vor.u32 %v3625_v5, %v2891_v3  ;;  %v2768_v9 = vor.u32 %v3591_v6, %v2765_v7  ;;  %v3623_v10 = vld [vmem:[%s4401_s5 + $0x1e4] sm:$0xf]  ;;  %v2893_v11 = vld [vmem:[%s4401_s5 + $0x1f0] sm:$0xf0]  ;;  %v2747_v12 = vld [vmem:[%s4401_s5 + $0xc0] sm:$0xf] }
  0x58   : > { %834 = vmatpush.bf16.msra.mxu0 %v2764_v4  ;;  %v2896_v13 = vor.u32 %v3623_v10, %v2893_v11  ;;  %v3589_v14 = vld [vmem:[%s4401_s5 + $0xcc] sm:$0xf0]  ;;  %v2875_v15 = vld [vmem:[%s4401_s5 + $0x1c0] sm:$0xf]  ;;  %v3587_v19 = vld [vmem:[%s4401_s5 + $0xc4] sm:$0xf] }
  0x59   : > { %v3621_v16 = vld [vmem:[%s4401_s5 + $0x1cc] sm:$0xf0]  ;;  %848 = vmatpush.bf16.msra.mxu1 %v2892_v8  ;;  %862 = vmatpush.bf16.msra.mxu2 %v2768_v9  ;;  %v2748_v17 = vor.u32 %v3589_v14, %v2747_v12  ;;  %v2749_v20 = vld [vmem:[%s4401_s5 + $0xd0] sm:$0xf0]  ;;  %v3619_v21 = vld [vmem:[%s4401_s5 + $0x1c4] sm:$0xf] }
  0x5a   : > { %v2876_v18 = vor.u32 %v3621_v16, %v2875_v15  ;;  %876 = vmatpush.bf16.msra.mxu3 %v2896_v13  ;;  %v2752_v22 = vor.u32 %v3587_v19, %v2749_v20  ;;  %v2877_v23 = vld [vmem:[%s4401_s5 + $0x1d0] sm:$0xf0]  ;;  %v2731_v24 = vld [vmem:[%s4401_s5 + $0xa0] sm:$0xf]  ;;  %v3585_v25 = vld [vmem:[%s4401_s5 + $0xac] sm:$0xf0] }
  0x5b   : > { %v2880_v26 = vor.u32 %v3619_v21, %v2877_v23  ;;  %v2859_v27 = vld [vmem:[%s4401_s5 + $0x1a0] sm:$0xf]  ;;  %v3617_v28 = vld [vmem:[%s4401_s5 + $0x1ac] sm:$0xf0]  ;;  %v3583_v29 = vld [vmem:[%s4401_s5 + $0xa4] sm:$0xf]  ;;  %v2732_v30 = vor.u32 %v3585_v25, %v2731_v24 }
  0x5c   : > { %835 = vmatpush.bf16.msra.mxu0 %v2748_v17  ;;  %v2733_v31 = vld [vmem:[%s4401_s5 + $0xb0] sm:$0xf0]  ;;  %v3615_v32 = vld [vmem:[%s4401_s5 + $0x1a4] sm:$0xf]  ;;  %v2860_v34 = vor.u32 %v3617_v28, %v2859_v27  ;;  %v2715_v36 = vld [vmem:[%s4401_s5 + $0x80] sm:$0xf] }
  0x5d   : > { %v2861_v33 = vld [vmem:[%s4401_s5 + $0x1b0] sm:$0xf0]  ;;  %849 = vmatpush.bf16.msra.mxu1 %v2876_v18  ;;  %863 = vmatpush.bf16.msra.mxu2 %v2752_v22  ;;  %v2736_v35 = vor.u32 %v3583_v29, %v2733_v31  ;;  %v3581_v37 = vld [vmem:[%s4401_s5 + $0x8c] sm:$0xf0]  ;;  %v2843_v38 = vld [vmem:[%s4401_s5 + $0x180] sm:$0xf] }
  0x5e   : > { %877 = vmatpush.bf16.msra.mxu3 %v2880_v26  ;;  %v2864_v39 = vor.u32 %v3615_v32, %v2861_v33  ;;  %v3613_v40 = vld [vmem:[%s4401_s5 + $0x18c] sm:$0xf0]  ;;  %v3579_v41 = vld [vmem:[%s4401_s5 + $0x84] sm:$0xf]  ;;  %v2717_v42 = vld [vmem:[%s4401_s5 + $0x90] sm:$0xf0]  ;;  %v2716_v45 = vor.u32 %v3581_v37, %v2715_v36 }
  0x5f   : > { %v3611_v43 = vld [vmem:[%s4401_s5 + $0x184] sm:$0xf]  ;;  %v2845_v44 = vld [vmem:[%s4401_s5 + $0x190] sm:$0xf0]  ;;  %v2844_v46 = vor.u32 %v3613_v40, %v2843_v38  ;;  %v2720_v47 = vor.u32 %v3579_v41, %v2717_v42  ;;  %v2699_v48 = vld [vmem:[%s4401_s5 + $0x60] sm:$0xf] }
  0x60   : > { %836 = vmatpush.bf16.msra.mxu0 %v2732_v30  ;;  %v3577_v49 = vld [vmem:[%s4401_s5 + $0x6c] sm:$0xf0]  ;;  %v2827_v50 = vld [vmem:[%s4401_s5 + $0x160] sm:$0xf]  ;;  %v2848_v51 = vor.u32 %v3611_v43, %v2845_v44  ;;  %v3575_v53 = vld [vmem:[%s4401_s5 + $0x64] sm:$0xf] }
  0x61   : > { %850 = vmatpush.bf16.msra.mxu1 %v2860_v34  ;;  %864 = vmatpush.bf16.msra.mxu2 %v2736_v35  ;;  %v3609_v52 = vld [vmem:[%s4401_s5 + $0x16c] sm:$0xf0]  ;;  %v2701_v54 = vld [vmem:[%s4401_s5 + $0x70] sm:$0xf0]  ;;  %v3607_v55 = vld [vmem:[%s4401_s5 + $0x164] sm:$0xf]  ;;  %v2700_v57 = vor.u32 %v3577_v49, %v2699_v48 }
  0x62   : > { %878 = vmatpush.bf16.msra.mxu3 %v2864_v39  ;;  %v2829_v56 = vld [vmem:[%s4401_s5 + $0x170] sm:$0xf0]  ;;  %v2828_v58 = vor.u32 %v3609_v52, %v2827_v50  ;;  %v2704_v59 = vor.u32 %v3575_v53, %v2701_v54  ;;  %v2683_v60 = vld [vmem:[%s4401_s5 + $0x40] sm:$0xf]  ;;  %v3573_v61 = vld [vmem:[%s4401_s5 + $0x4c] sm:$0xf0] }
  0x63   : > { %v2811_v62 = vld [vmem:[%s4401_s5 + $0x140] sm:$0xf]  ;;  %v2832_v63 = vor.u32 %v3607_v55, %v2829_v56  ;;  %v3605_v0 = vld [vmem:[%s4401_s5 + $0x14c] sm:$0xf0]  ;;  %v3571_v1 = vld [vmem:[%s4401_s5 + $0x44] sm:$0xf]  ;;  %v2684_v5 = vor.u32 %v3573_v61, %v2683_v60 }
  0x64   : > { %837 = vmatpush.bf16.msra.mxu0 %v2716_v45  ;;  %v2685_v2 = vld [vmem:[%s4401_s5 + $0x50] sm:$0xf0]  ;;  %v3603_v3 = vld [vmem:[%s4401_s5 + $0x144] sm:$0xf]  ;;  %v2812_v6 = vor.u32 %v3605_v0, %v2811_v62  ;;  %v2667_v8 = vld [vmem:[%s4401_s5 + $0x20] sm:$0xf] }
  0x65   : > { %851 = vmatpush.bf16.msra.mxu1 %v2844_v46  ;;  %865 = vmatpush.bf16.msra.mxu2 %v2720_v47  ;;  %v2813_v4 = vld [vmem:[%s4401_s5 + $0x150] sm:$0xf0]  ;;  %v2688_v7 = vor.u32 %v3571_v1, %v2685_v2  ;;  %v3569_v9 = vld [vmem:[%s4401_s5 + $0x2c] sm:$0xf0]  ;;  %v2795_v10 = vld [vmem:[%s4401_s5 + $0x120] sm:$0xf] }
  0x66   : > { %879 = vmatpush.bf16.msra.mxu3 %v2848_v51  ;;  %v2816_v11 = vor.u32 %v3603_v3, %v2813_v4  ;;  %v3601_v12 = vld [vmem:[%s4401_s5 + $0x12c] sm:$0xf0]  ;;  %v3567_v13 = vld [vmem:[%s4401_s5 + $0x24] sm:$0xf]  ;;  %v2669_v14 = vld [vmem:[%s4401_s5 + $0x30] sm:$0xf0]  ;;  %v2668_v17 = vor.u32 %v3569_v9, %v2667_v8 }
  0x67   : > { %v3599_v15 = vld [vmem:[%s4401_s5 + $0x124] sm:$0xf]  ;;  %v2797_v16 = vld [vmem:[%s4401_s5 + $0x130] sm:$0xf0]  ;;  %v2651_v18 = vld [vmem:[%s4401_s5] sm:$0xf]  ;;  %v2796_v21 = vor.u32 %v3601_v12, %v2795_v10  ;;  %v2672_v22 = vor.u32 %v3567_v13, %v2669_v14 }
  0x68   : > { %838 = vmatpush.bf16.msra.mxu0 %v2700_v57  ;;  %v3565_v19 = vld [vmem:[%s4401_s5 + $0xc] sm:$0xf0]  ;;  %v2779_v20 = vld [vmem:[%s4401_s5 + $0x100] sm:$0xf]  ;;  %v3563_v24 = vld [vmem:[%s4401_s5 + $0x4] sm:$0xf]  ;;  %v2800_v26 = vor.u32 %v3599_v15, %v2797_v16 }
  0x69   : > { %852 = vmatpush.bf16.msra.mxu1 %v2828_v58  ;;  %866 = vmatpush.bf16.msra.mxu2 %v2704_v59  ;;  %v3597_v23 = vld [vmem:[%s4401_s5 + $0x10c] sm:$0xf0]  ;;  %v2653_v25 = vld [vmem:[%s4401_s5 + $0x10] sm:$0xf0]  ;;  %v3595_v27 = vld [vmem:[%s4401_s5 + $0x104] sm:$0xf]  ;;  %v2652_v33 = vor.u32 %v3565_v19, %v2651_v18 }
  0x6a   : > { %880 = vmatpush.bf16.msra.mxu3 %v2832_v63  ;;  %v2781_v28 = vld [vmem:[%s4401_s5 + $0x110] sm:$0xf0]  ;;  %v2771_v29 = vld [vmem:[%s4401_s5 + $0xe8] sm:$0xf]  ;;  %v3594_v30 = vld [vmem:[%s4401_s5 + $0xf4] sm:$0xf0]  ;;  %v2780_v37 = vor.u32 %v3597_v23, %v2779_v20  ;;  %v2656_v38 = vor.u32 %v3563_v24, %v2653_v25 }
  0x6b   : > { %v2899_v31 = vld [vmem:[%s4401_s5 + $0x1e8] sm:$0xf]  ;;  %v3626_v32 = vld [vmem:[%s4401_s5 + $0x1f4] sm:$0xf0]  ;;  %v3592_v34 = vld [vmem:[%s4401_s5 + $0xec] sm:$0xf]  ;;  %v2784_v42 = vor.u32 %v3595_v27, %v2781_v28  ;;  %v2772_v43 = vor.u32 %v3594_v30, %v2771_v29 }
  0x6c   : > { %839 = vmatpush.bf16.msra.mxu0 %v2684_v5  ;;  %v2773_v35 = vld [vmem:[%s4401_s5 + $0xf8] sm:$0xf0]  ;;  %v3624_v36 = vld [vmem:[%s4401_s5 + $0x1ec] sm:$0xf]  ;;  %v2643_v40 = vld [vmem:[%s4394_s10] sm:$0xf]  ;;  %v2900_v46 = vor.u32 %v3626_v32, %v2899_v31 }
  0x6d   : > { %853 = vmatpush.bf16.msra.mxu1 %v2812_v6  ;;  %867 = vmatpush.bf16.msra.mxu2 %v2688_v7  ;;  %v2901_v39 = vld [vmem:[%s4401_s5 + $0x1f8] sm:$0xf0]  ;;  %v3562_v41 = vld [vmem:[%s4394_s10 + $0x4] sm:$0xf0]  ;;  %v3561_v44 = vld [vmem:[%s4394_s10 + $0x4] sm:$0xf]  ;;  %v2776_v47 = vor.u32 %v3592_v34, %v2773_v35 }
  0x6e   : > { %881 = vmatpush.bf16.msra.mxu3 %v2816_v11  ;;  %v2645_v45 = vld [vmem:[%s4394_s10 + $0x8] sm:$0xf0]  ;;  %v2755_v48 = vld [vmem:[%s4401_s5 + $0xc8] sm:$0xf]  ;;  %v3590_v49 = vld [vmem:[%s4401_s5 + $0xd4] sm:$0xf0]  ;;  %v2904_v51 = vor.u32 %v3624_v36, %v2901_v39  ;;  %v4502_v55 = vor.u32 %v3562_v41, %v2643_v40 }
  0x6f   : > { %v2883_v50 = vld [vmem:[%s4401_s5 + $0x1c8] sm:$0xf]  ;;  %v3622_v52 = vld [vmem:[%s4401_s5 + $0x1d4] sm:$0xf0]  ;;  %v3588_v53 = vld [vmem:[%s4401_s5 + $0xcc] sm:$0xf]  ;;  %v4506_v58 = vor.u32 %v3561_v44, %v2645_v45  ;;  %v2756_v59 = vor.u32 %v3590_v49, %v2755_v48 }
  0x70   : > { %840 = vmatpush.bf16.msra.mxu0 %v2668_v17  ;;  %v2757_v54 = vld [vmem:[%s4401_s5 + $0xd8] sm:$0xf0]  ;;  %v3620_v56 = vld [vmem:[%s4401_s5 + $0x1cc] sm:$0xf]  ;;  %v2884_v60 = vor.u32 %v3622_v52, %v2883_v50  ;;  %v2739_v62 = vld [vmem:[%s4401_s5 + $0xa8] sm:$0xf] }
  0x71   : > { %854 = vmatpush.bf16.msra.mxu1 %v2796_v21  ;;  %868 = vmatpush.bf16.msra.mxu2 %v2672_v22  ;;  %v2885_v57 = vld [vmem:[%s4401_s5 + $0x1d8] sm:$0xf0]  ;;  %v2760_v61 = vor.u32 %v3588_v53, %v2757_v54  ;;  %v3586_v63 = vld [vmem:[%s4401_s5 + $0xb4] sm:$0xf0]  ;;  %v2867_v0 = vld [vmem:[%s4401_s5 + $0x1a8] sm:$0xf] }
  0x72   : > { %882 = vmatpush.bf16.msra.mxu3 %v2800_v26  ;;  %v2888_v1 = vor.u32 %v3620_v56, %v2885_v57  ;;  %v3618_v2 = vld [vmem:[%s4401_s5 + $0x1b4] sm:$0xf0]  ;;  %v3584_v3 = vld [vmem:[%s4401_s5 + $0xac] sm:$0xf]  ;;  %v2741_v4 = vld [vmem:[%s4401_s5 + $0xb8] sm:$0xf0]  ;;  %v2740_v7 = vor.u32 %v3586_v63, %v2739_v62 }
  0x73   : > { %v3616_v5 = vld [vmem:[%s4401_s5 + $0x1ac] sm:$0xf]  ;;  %v2869_v6 = vld [vmem:[%s4401_s5 + $0x1b8] sm:$0xf0]  ;;  %v2868_v8 = vor.u32 %v3618_v2, %v2867_v0  ;;  %v2744_v9 = vor.u32 %v3584_v3, %v2741_v4  ;;  %v2723_v10 = vld [vmem:[%s4401_s5 + $0x88] sm:$0xf] }
  0x74   : > { %841 = vmatpush.bf16.msra.mxu0 %v2652_v33  ;;  %v3582_v11 = vld [vmem:[%s4401_s5 + $0x94] sm:$0xf0]  ;;  %v2851_v12 = vld [vmem:[%s4401_s5 + $0x188] sm:$0xf]  ;;  %v2872_v13 = vor.u32 %v3616_v5, %v2869_v6  ;;  %v3580_v15 = vld [vmem:[%s4401_s5 + $0x8c] sm:$0xf] }
  0x75   : > { %855 = vmatpush.bf16.msra.mxu1 %v2780_v37  ;;  %869 = vmatpush.bf16.msra.mxu2 %v2656_v38  ;;  %v3614_v14 = vld [vmem:[%s4401_s5 + $0x194] sm:$0xf0]  ;;  %v2725_v16 = vld [vmem:[%s4401_s5 + $0x98] sm:$0xf0]  ;;  %v3612_v17 = vld [vmem:[%s4401_s5 + $0x18c] sm:$0xf]  ;;  %v2724_v19 = vor.u32 %v3582_v11, %v2723_v10 }
  0x76   : > { %883 = vmatpush.bf16.msra.mxu3 %v2784_v42  ;;  %v2853_v18 = vld [vmem:[%s4401_s5 + $0x198] sm:$0xf0]  ;;  %v2852_v20 = vor.u32 %v3614_v14, %v2851_v12  ;;  %v2728_v21 = vor.u32 %v3580_v15, %v2725_v16  ;;  %v2707_v22 = vld [vmem:[%s4401_s5 + $0x68] sm:$0xf]  ;;  %v3578_v23 = vld [vmem:[%s4401_s5 + $0x74] sm:$0xf0] }
  0x77   : > { %842 = vmatmul.bf16.vlgmr.msra.gmra.mxu0 %v4502_v55  ;;  %v2835_v24 = vld [vmem:[%s4401_s5 + $0x168] sm:$0xf]  ;;  %v2856_v25 = vor.u32 %v3612_v17, %v2853_v18  ;;  %v3610_v26 = vld [vmem:[%s4401_s5 + $0x174] sm:$0xf0]  ;;  %v3576_v27 = vld [vmem:[%s4401_s5 + $0x6c] sm:$0xf]  ;;  %v2708_v31 = vor.u32 %v3578_v23, %v2707_v22 }
  0x78   : > { %890 = vmatpush.bf16.msrb.mxu0 %v2772_v43  ;;  %870 = vmatmul.bf16.vlgmr.msra.gmra.mxu2 %v4502_v55  ;;  %v2709_v28 = vld [vmem:[%s4401_s5 + $0x78] sm:$0xf0]  ;;  %v3608_v29 = vld [vmem:[%s4401_s5 + $0x16c] sm:$0xf]  ;;  %v2836_v32 = vor.u32 %v3610_v26, %v2835_v24  ;;  %v2691_v34 = vld [vmem:[%s4401_s5 + $0x48] sm:$0xf] }
  0x79   : > { %904 = vmatpush.bf16.msrb.mxu1 %v2900_v46  ;;  %918 = vmatpush.bf16.msrb.mxu2 %v2776_v47  ;;  %v2837_v30 = vld [vmem:[%s4401_s5 + $0x178] sm:$0xf0]  ;;  %v2712_v33 = vor.u32 %v3576_v27, %v2709_v28  ;;  %v3574_v35 = vld [vmem:[%s4401_s5 + $0x54] sm:$0xf0]  ;;  %v2819_v36 = vld [vmem:[%s4401_s5 + $0x148] sm:$0xf] }
  0x7a   : > { %932 = vmatpush.bf16.msrb.mxu3 %v2904_v51  ;;  %856 = vmatmul.bf16.vlgmr.msra.gmra.mxu1 %v4506_v58  ;;  %v2840_v37 = vor.u32 %v3608_v29, %v2837_v30  ;;  %v3606_v38 = vld [vmem:[%s4401_s5 + $0x154] sm:$0xf0]  ;;  %v3572_v39 = vld [vmem:[%s4401_s5 + $0x4c] sm:$0xf]  ;;  %v2693_v40 = vld [vmem:[%s4401_s5 + $0x58] sm:$0xf0]  ;;  %v2692_v43 = vor.u32 %v3574_v35, %v2691_v34 }
  0x7b   : > { %884 = vmatmul.bf16.vlgmr.msra.gmra.mxu3 %v4506_v58  ;;  %v3604_v41 = vld [vmem:[%s4401_s5 + $0x14c] sm:$0xf]  ;;  %v2821_v42 = vld [vmem:[%s4401_s5 + $0x158] sm:$0xf0]  ;;  %v2820_v44 = vor.u32 %v3606_v38, %v2819_v36  ;;  %v2696_v45 = vor.u32 %v3572_v39, %v2693_v40  ;;  %v2675_v46 = vld [vmem:[%s4401_s5 + $0x28] sm:$0xf] }
  0x7c   : > { %891 = vmatpush.bf16.msrb.mxu0 %v2756_v59  ;;  %v3570_v47 = vld [vmem:[%s4401_s5 + $0x34] sm:$0xf0]  ;;  %v2803_v48 = vld [vmem:[%s4401_s5 + $0x128] sm:$0xf]  ;;  %v2824_v49 = vor.u32 %v3604_v41, %v2821_v42  ;;  %v3568_v51 = vld [vmem:[%s4401_s5 + $0x2c] sm:$0xf] }
  0x7d   : > { %905 = vmatpush.bf16.msrb.mxu1 %v2884_v60  ;;  %919 = vmatpush.bf16.msrb.mxu2 %v2760_v61  ;;  %v3602_v50 = vld [vmem:[%s4401_s5 + $0x134] sm:$0xf0]  ;;  %v2677_v52 = vld [vmem:[%s4401_s5 + $0x38] sm:$0xf0]  ;;  %v3600_v53 = vld [vmem:[%s4401_s5 + $0x12c] sm:$0xf]  ;;  %v2676_v56 = vor.u32 %v3570_v47, %v2675_v46 }
  0x7e   : > { %933 = vmatpush.bf16.msrb.mxu3 %v2888_v1  ;;  %v2805_v54 = vld [vmem:[%s4401_s5 + $0x138] sm:$0xf0]  ;;  %v2804_v57 = vor.u32 %v3602_v50, %v2803_v48  ;;  %v2680_v59 = vor.u32 %v3568_v51, %v2677_v52  ;;  %v2659_v60 = vld [vmem:[%s4401_s5 + $0x8] sm:$0xf]  ;;  %v3566_v61 = vld [vmem:[%s4401_s5 + $0x14] sm:$0xf0] }
  0x7f   : > { %v2787_v62 = vld [vmem:[%s4401_s5 + $0x108] sm:$0xf]  ;;  %v2808_v63 = vor.u32 %v3600_v53, %v2805_v54  ;;  %v3598_v0 = vld [vmem:[%s4401_s5 + $0x114] sm:$0xf0]  ;;  %v3564_v1 = vld [vmem:[%s4401_s5 + $0xc] sm:$0xf]  ;;  %v2660_v5 = vor.u32 %v3566_v61, %v2659_v60 }
  0x80   : > { %892 = vmatpush.bf16.msrb.mxu0 %v2740_v7  ;;  %v2661_v2 = vld [vmem:[%s4401_s5 + $0x18] sm:$0xf0]  ;;  %v3596_v3 = vld [vmem:[%s4401_s5 + $0x10c] sm:$0xf]  ;;  %v2788_v6 = vor.u32 %v3598_v0, %v2787_v62  ;;  %v430_v10 = vld [vmem:[#allocation2 + $0x30] sm:$0xff]  ;;  %p2905_p1 = scmp.ne.s32.totalorder %s4208_s27, 3 }
  0x81   : > { %906 = vmatpush.bf16.msrb.mxu1 %v2868_v8  ;;  %920 = vmatpush.bf16.msrb.mxu2 %v2744_v9  ;;  %v2789_v4 = vld [vmem:[%s4401_s5 + $0x118] sm:$0xf0]  ;;  %v2664_v7 = vor.u32 %v3564_v1, %v2661_v2  ;;  %v431_v15 = vld [vmem:[#allocation2] sm:$0xff] }
  0x82   : > { %934 = vmatpush.bf16.msrb.mxu3 %v2872_v13  ;;  %v2792_v8 = vor.u32 %v3596_v3, %v2789_v4  ;;  %v432_v28 = vld [vmem:[#allocation2 + $0x18] sm:$0xff] }
  0x84   : > { %893 = vmatpush.bf16.msrb.mxu0 %v2724_v19 }
  0x85   : > { %907 = vmatpush.bf16.msrb.mxu1 %v2852_v20  ;;  %921 = vmatpush.bf16.msrb.mxu2 %v2728_v21  ;;  %v434_v20 = vld [vmem:[#allocation2 + $0x8] sm:$0xff] }
  0x86   : > { %935 = vmatpush.bf16.msrb.mxu3 %v2856_v25 }
  0x88   : > { %894 = vmatpush.bf16.msrb.mxu0 %v2708_v31 }
  0x89   : > { %908 = vmatpush.bf16.msrb.mxu1 %v2836_v32  ;;  %922 = vmatpush.bf16.msrb.mxu2 %v2712_v33  ;;  %v433_v33 = vld [vmem:[#allocation2 + $0x10] sm:$0xff] }
  0x8a   : > { %936 = vmatpush.bf16.msrb.mxu3 %v2840_v37  ;;  %v436_v37 = vld [vmem:[#allocation2 + $0x28] sm:$0xff] }
  0x8c   : > { %895 = vmatpush.bf16.msrb.mxu0 %v2692_v43  ;;  %v437_v43 = vld [vmem:[#allocation2 + $0x38] sm:$0xff] }
  0x8d   : > { %909 = vmatpush.bf16.msrb.mxu1 %v2820_v44  ;;  %923 = vmatpush.bf16.msrb.mxu2 %v2696_v45 }
  0x8e   : > { %937 = vmatpush.bf16.msrb.mxu3 %v2824_v49 }
  0x90   : > { %896 = vmatpush.bf16.msrb.mxu0 %v2676_v56 }
  0x91   : > { %910 = vmatpush.bf16.msrb.mxu1 %v2804_v57  ;;  %924 = vmatpush.bf16.msrb.mxu2 %v2680_v59 }
  0x92   : > { %938 = vmatpush.bf16.msrb.mxu3 %v2808_v63 }
  0x94   : > { %897 = vmatpush.bf16.msrb.mxu0 %v2660_v5 }
  0x95   : > { %911 = vmatpush.bf16.msrb.mxu1 %v2788_v6  ;;  %925 = vmatpush.bf16.msrb.mxu2 %v2664_v7 }
  0x96   : > { %939 = vmatpush.bf16.msrb.mxu3 %v2792_v8 }
  0x97   : > { %898 = vmatmul.bf16.vlgmr.msrb.gmra.mxu0 %v4502_v55 }
  0x98   : > { %912 = vmatmul.bf16.vlgmr.msrb.gmra.mxu1 %v4506_v58  ;;  %926 = vmatmul.bf16.vlgmr.msrb.gmra.mxu2 %v4502_v55 }
  0x99   : > { %940 = vmatmul.bf16.vlgmr.msrb.gmra.mxu3 %v4506_v58  ;;  %v435_v58 = vld [vmem:[#allocation2 + $0x20] sm:$0xff] }
  0xf4   : > { %v843_v9 = vpop.f32.mrf.mxu0 }
  0xf7   : > { %v857_v11 = vpop.f32.mrf.mxu1 }
  0xf8   : > { %v858_v12 = vadd.f32 %v857_v11, %v843_v9 }
  0xfa   : > { %v946_v13 = vadd.f32 %v858_v12, %v430_v10 }
  0xfb   : > { %v871_v14 = vpop.f32.mrf.mxu2 }
  0xfc   : > { %954 = vst [vmem:[#allocation2 + $0x30] sm:$0xff] %v946_v13  ;;  %v845_v18 = vpop.f32.mrf.mxu0 }
  0xfe   : > { %v885_v16 = vpop.f32.mrf.mxu3 }
  0xff   : > { %v886_v17 = vadd.f32 %v885_v16, %v871_v14  ;;  %v859_v21 = vpop.f32.mrf.mxu1 }
 0x100   : > { %v860_v22 = vadd.f32 %v859_v21, %v845_v18 }
 0x101   : > { %v947_v19 = vadd.f32 %v886_v17, %v431_v15 }
 0x102   : > { %v950_v23 = vadd.f32 %v860_v22, %v434_v20 }
 0x103   : > { %955 = vst [vmem:[#allocation2] sm:$0xff] %v947_v19  ;;  %v873_v55 = vpop.f32.mrf.mxu2 }
 0x104   : > { %958 = vst [vmem:[#allocation2 + $0x8] sm:$0xff] %v950_v23 }
 0x106   : > { %v887_v24 = vpop.f32.mrf.mxu3 }
 0x107   : > { %v888_v25 = vadd.f32 %v887_v24, %v873_v55 }
 0x109   : > { %v951_v26 = vadd.f32 %v888_v25, %v435_v58 }
 0x10b   : > { %959 = vst [vmem:[#allocation2 + $0x20] sm:$0xff] %v951_v26 }
 0x114   : > { %v899_v27 = vpop.f32.mrf.mxu0 }
 0x115   : > { %v913_v29 = vpop.f32.mrf.mxu1 }
 0x116   : > { %v914_v30 = vadd.f32 %v913_v29, %v899_v27 }
 0x118   : > { %v948_v31 = vadd.f32 %v914_v30, %v432_v28 }
 0x11a   : > { %956 = vst [vmem:[#allocation2 + $0x18] sm:$0xff] %v948_v31 }
 0x11b   : > { %v927_v32 = vpop.f32.mrf.mxu2 }
 0x11c   : > { %v941_v34 = vpop.f32.mrf.mxu3  ;;  %v901_v35 = vpop.f32.mrf.mxu0 }
 0x11d   : > { %v942_v36 = vadd.f32 %v941_v34, %v927_v32  ;;  %v915_v38 = vpop.f32.mrf.mxu1 }
 0x11e   : > { %v916_v39 = vadd.f32 %v915_v38, %v901_v35 }
 0x11f   : > { %v949_v40 = vadd.f32 %v942_v36, %v433_v33 }
 0x120   : > { %v952_v41 = vadd.f32 %v916_v39, %v436_v37 }
 0x121   : > { %957 = vst [vmem:[#allocation2 + $0x10] sm:$0xff] %v949_v40 }
 0x122   : > { %960 = vst [vmem:[#allocation2 + $0x28] sm:$0xff] %v952_v41 }
 0x123   : > { %v929_v42 = vpop.f32.mrf.mxu2 }
 0x124   : > { %v943_v44 = vpop.f32.mrf.mxu3 }
 0x125   : > { %v944_v45 = vadd.f32 %v943_v44, %v929_v42  ;;  %965 = sbr.rel (%p2905_p1) target bundleno = 749 (0x2ed), region = 80 }
 0x127   : > { %v953_v46 = vadd.f32 %v944_v45, %v437_v43 }
 0x129   : > { %961 = vst [vmem:[#allocation2 + $0x38] sm:$0xff] %v953_v46 }
 0x12a   : > { %v3020_v47 = vld [vmem:[#allocation9 + $0xe0] sm:$0xf]  ;;  %v3657_v48 = vld [vmem:[#allocation9 + $0xec] sm:$0xf0] }
 0x12b   : > { %v3148_v49 = vld [vmem:[#allocation9 + $0x1e0] sm:$0xf]  ;;  %v3021_v50 = vor.u32 %v3657_v48, %v3020_v47  ;;  %v3689_v51 = vld [vmem:[#allocation9 + $0x1ec] sm:$0xf0] }
 0x12c   : > { %v3276_v52 = vld [vmem:[#allocation9 + $0x2e0] sm:$0xf]  ;;  %v3721_v53 = vld [vmem:[#allocation9 + $0x2ec] sm:$0xf0]  ;;  %v3149_v54 = vor.u32 %v3689_v51, %v3148_v49 }
 0x12d   : > { %v3277_v56 = vor.u32 %v3721_v53, %v3276_v52  ;;  %v3404_v57 = vld [vmem:[#allocation9 + $0x3e0] sm:$0xf]  ;;  %v3753_v59 = vld [vmem:[#allocation9 + $0x3ec] sm:$0xf0]  ;;  %1774 = vmatpush.bf16.msra.mxu0 %v3021_v50 }
 0x12e   : > { %v3004_v60 = vld [vmem:[#allocation9 + $0xc0] sm:$0xf]  ;;  %v3405_v61 = vor.u32 %v3753_v59, %v3404_v57  ;;  %v3653_v62 = vld [vmem:[#allocation9 + $0xcc] sm:$0xf0]  ;;  %1788 = vmatpush.bf16.msra.mxu1 %v3149_v54 }
 0x12f   : > { %v3132_v63 = vld [vmem:[#allocation9 + $0x1c0] sm:$0xf]  ;;  %v3685_v0 = vld [vmem:[#allocation9 + $0x1cc] sm:$0xf0]  ;;  %1802 = vmatpush.bf16.msra.mxu2 %v3277_v56  ;;  %v3005_v1 = vor.u32 %v3653_v62, %v3004_v60 }
 0x130   : > { %v3133_v2 = vor.u32 %v3685_v0, %v3132_v63  ;;  %v3260_v3 = vld [vmem:[#allocation9 + $0x2c0] sm:$0xf]  ;;  %v3717_v4 = vld [vmem:[#allocation9 + $0x2cc] sm:$0xf0]  ;;  %1816 = vmatpush.bf16.msra.mxu3 %v3405_v61 }
 0x131   : > { %v3388_v5 = vld [vmem:[#allocation9 + $0x3c0] sm:$0xf]  ;;  %v3261_v6 = vor.u32 %v3717_v4, %v3260_v3  ;;  %v3749_v7 = vld [vmem:[#allocation9 + $0x3cc] sm:$0xf0]  ;;  %1775 = vmatpush.bf16.msra.mxu0 %v3005_v1 }
 0x132   : > { %v2988_v8 = vld [vmem:[#allocation9 + $0xa0] sm:$0xf]  ;;  %v3649_v9 = vld [vmem:[#allocation9 + $0xac] sm:$0xf0]  ;;  %v3389_v10 = vor.u32 %v3749_v7, %v3388_v5  ;;  %1789 = vmatpush.bf16.msra.mxu1 %v3133_v2 }
 0x133   : > { %v3116_v11 = vld [vmem:[#allocation9 + $0x1a0] sm:$0xf]  ;;  %v3681_v12 = vld [vmem:[#allocation9 + $0x1ac] sm:$0xf0]  ;;  %v2989_v14 = vor.u32 %v3649_v9, %v2988_v8  ;;  %1803 = vmatpush.bf16.msra.mxu2 %v3261_v6 }
 0x134   : > { %v3244_v13 = vld [vmem:[#allocation9 + $0x2a0] sm:$0xf]  ;;  %v3713_v15 = vld [vmem:[#allocation9 + $0x2ac] sm:$0xf0]  ;;  %v3117_v18 = vor.u32 %v3681_v12, %v3116_v11  ;;  %1817 = vmatpush.bf16.msra.mxu3 %v3389_v10  ;;  %v3655_v12 = vld [vmem:[#allocation9 + $0xe4] sm:$0xf] }
 0x135   : > { %v3372_v16 = vld [vmem:[#allocation9 + $0x3a0] sm:$0xf]  ;;  %v3745_v17 = vld [vmem:[#allocation9 + $0x3ac] sm:$0xf0]  ;;  %v3245_v19 = vor.u32 %v3713_v15, %v3244_v13  ;;  %1776 = vmatpush.bf16.msra.mxu0 %v2989_v14  ;;  %v968_v13 = vld [vmem:[#allocation2 + $0x18] sm:$0xff] }
 0x136   : > { %v2972_v20 = vld [vmem:[#allocation9 + $0x80] sm:$0xf]  ;;  %v3645_v21 = vld [vmem:[#allocation9 + $0x8c] sm:$0xf0]  ;;  %v3373_v23 = vor.u32 %v3745_v17, %v3372_v16  ;;  %1790 = vmatpush.bf16.msra.mxu1 %v3117_v18  ;;  %v972_v14 = vld [vmem:[#allocation2 + $0x28] sm:$0xff] }
 0x137   : > { %v3100_v22 = vld [vmem:[#allocation9 + $0x180] sm:$0xf]  ;;  %v3677_v55 = vld [vmem:[#allocation9 + $0x18c] sm:$0xf0]  ;;  %v2973_v27 = vor.u32 %v3645_v21, %v2972_v20  ;;  %1804 = vmatpush.bf16.msra.mxu2 %v3245_v19  ;;  %v974_v15 = vld [vmem:[#allocation8] sm:$0xf] }
 0x138   : > { %v3228_v58 = vld [vmem:[#allocation9 + $0x280] sm:$0xf]  ;;  %v3709_v24 = vld [vmem:[#allocation9 + $0x28c] sm:$0xf0]  ;;  %v3101_v28 = vor.u32 %v3677_v55, %v3100_v22  ;;  %1818 = vmatpush.bf16.msra.mxu3 %v3373_v23  ;;  %v978_v17 = vperm.slane %v974_v15, 2  ;;  %v970_v19 = vld [vmem:[#allocation2 + $0x8] sm:$0xff] }
 0x139   : > { %v3356_v25 = vld [vmem:[#allocation9 + $0x380] sm:$0xf]  ;;  %v3741_v26 = vld [vmem:[#allocation9 + $0x38c] sm:$0xf0]  ;;  %v3229_v29 = vor.u32 %v3709_v24, %v3228_v58  ;;  %1777 = vmatpush.bf16.msra.mxu0 %v2973_v27  ;;  %v976_v20 = vperm.slane %v974_v15, 0  ;;  %v979_v22 = vperm.slane %v974_v15, 3 }
 0x13a   : > { %v2956_v30 = vld [vmem:[#allocation9 + $0x60] sm:$0xf]  ;;  %v3641_v31 = vld [vmem:[#allocation9 + $0x6c] sm:$0xf0]  ;;  %v3357_v33 = vor.u32 %v3741_v26, %v3356_v25  ;;  %1791 = vmatpush.bf16.msra.mxu1 %v3101_v28  ;;  %v3022_v58 = vld [vmem:[#allocation9 + $0xf0] sm:$0xf0] }
 0x13b   : > { %v3084_v32 = vld [vmem:[#allocation9 + $0x160] sm:$0xf]  ;;  %v3673_v34 = vld [vmem:[#allocation9 + $0x16c] sm:$0xf0]  ;;  %v2957_v39 = vor.u32 %v3641_v31, %v2956_v30  ;;  %1805 = vmatpush.bf16.msra.mxu2 %v3229_v29  ;;  %v3687_v24 = vld [vmem:[#allocation9 + $0x1e4] sm:$0xf]  ;;  %v4568_v31 = vadd.f32 %v978_v17, %v968_v13 }
 0x13c   : > { %v3212_v35 = vld [vmem:[#allocation9 + $0x260] sm:$0xf]  ;;  %v3705_v36 = vld [vmem:[#allocation9 + $0x26c] sm:$0xf0]  ;;  %v3085_v40 = vor.u32 %v3673_v34, %v3084_v32  ;;  %1819 = vmatpush.bf16.msra.mxu3 %v3357_v33  ;;  %v973_v25 = vld [vmem:[#allocation2 + $0x38] sm:$0xff]  ;;  %v977_v26 = vperm.slane %v974_v15, 1  ;;  %v4570_v32 = vadd.f32 %v978_v17, %v972_v14 }
 0x13d   : > { %v3340_v37 = vld [vmem:[#allocation9 + $0x360] sm:$0xf]  ;;  %v3737_v38 = vld [vmem:[#allocation9 + $0x36c] sm:$0xf0]  ;;  %v3213_v41 = vor.u32 %v3705_v36, %v3212_v35  ;;  %1778 = vmatpush.bf16.msra.mxu0 %v2957_v39  ;;  %v3150_v28 = vld [vmem:[#allocation9 + $0x1f0] sm:$0xf0]  ;;  %v4574_v36 = vadd.f32 %v976_v20, %v970_v19 }
 0x13e   : > { %v2940_v42 = vld [vmem:[#allocation9 + $0x40] sm:$0xf]  ;;  %v3637_v43 = vld [vmem:[#allocation9 + $0x4c] sm:$0xf0]  ;;  %v3341_v45 = vor.u32 %v3737_v38, %v3340_v37  ;;  %1792 = vmatpush.bf16.msra.mxu1 %v3085_v40  ;;  %v3719_v29 = vld [vmem:[#allocation9 + $0x2e4] sm:$0xf]  ;;  %v4578_v38 = vadd.f32 %v979_v22, %v973_v25  ;;  %v3025_v40 = vor.u32 %v3655_v12, %v3022_v58 }
 0x13f   : > { %v3068_v44 = vld [vmem:[#allocation9 + $0x140] sm:$0xf]  ;;  %v3669_v46 = vld [vmem:[#allocation9 + $0x14c] sm:$0xf0]  ;;  %v2941_v51 = vor.u32 %v3637_v43, %v2940_v42  ;;  %1806 = vmatpush.bf16.msra.mxu2 %v3213_v41  ;;  %v3278_v30 = vld [vmem:[#allocation9 + $0x2f0] sm:$0xf0]  ;;  %v3153_v43 = vor.u32 %v3687_v24, %v3150_v28 }
 0x140   : > { %v3196_v47 = vld [vmem:[#allocation9 + $0x240] sm:$0xf]  ;;  %v3701_v48 = vld [vmem:[#allocation9 + $0x24c] sm:$0xf0]  ;;  %v3069_v54 = vor.u32 %v3669_v46, %v3068_v44  ;;  %1820 = vmatpush.bf16.msra.mxu3 %v3341_v45  ;;  %v3751_v34 = vld [vmem:[#allocation9 + $0x3e4] sm:$0xf]  ;;  %v3281_v44 = vor.u32 %v3719_v29, %v3278_v30 }
 0x141   : > { %v3324_v49 = vld [vmem:[#allocation9 + $0x340] sm:$0xf]  ;;  %v3733_v50 = vld [vmem:[#allocation9 + $0x34c] sm:$0xf0]  ;;  %v3197_v56 = vor.u32 %v3701_v48, %v3196_v47  ;;  %1779 = vmatpush.bf16.msra.mxu0 %v2941_v51  ;;  %v3406_v35 = vld [vmem:[#allocation9 + $0x3f0] sm:$0xf0]  ;;  %v4586_v51 = vpack.c.bf16 %v4570_v32, %v4568_v31 }
 0x142   : > { %v2924_v52 = vld [vmem:[#allocation9 + $0x20] sm:$0xf]  ;;  %v3633_v53 = vld [vmem:[#allocation9 + $0x2c] sm:$0xf0]  ;;  %v3325_v61 = vor.u32 %v3733_v50, %v3324_v49  ;;  %1793 = vmatpush.bf16.msra.mxu1 %v3069_v54  ;;  %v3651_v45 = vld [vmem:[#allocation9 + $0xc4] sm:$0xf]  ;;  %v3409_v50 = vor.u32 %v3751_v34, %v3406_v35 }
 0x143   : > { %v3052_v57 = vld [vmem:[#allocation9 + $0x120] sm:$0xf]  ;;  %v3665_v59 = vld [vmem:[#allocation9 + $0x12c] sm:$0xf0]  ;;  %v2925_v4 = vor.u32 %v3633_v53, %v2924_v52  ;;  %1807 = vmatpush.bf16.msra.mxu2 %v3197_v56  ;;  %v3006_v46 = vld [vmem:[#allocation9 + $0xd0] sm:$0xf0] }
 0x144   : > { %v3180_v60 = vld [vmem:[#allocation9 + $0x220] sm:$0xf]  ;;  %v3697_v62 = vld [vmem:[#allocation9 + $0x22c] sm:$0xf0]  ;;  %v3053_v8 = vor.u32 %v3665_v59, %v3052_v57  ;;  %1821 = vmatpush.bf16.msra.mxu3 %v3325_v61  ;;  %v3683_v47 = vld [vmem:[#allocation9 + $0x1c4] sm:$0xf]  ;;  %v3009_v61 = vor.u32 %v3651_v45, %v3006_v46 }
 0x145   : > { %v3308_v63 = vld [vmem:[#allocation9 + $0x320] sm:$0xf]  ;;  %v3729_v0 = vld [vmem:[#allocation9 + $0x32c] sm:$0xf0]  ;;  %v3181_v9 = vor.u32 %v3697_v62, %v3180_v60  ;;  %1780 = vmatpush.bf16.msra.mxu0 %v2925_v4  ;;  %v3134_v52 = vld [vmem:[#allocation9 + $0x1d0] sm:$0xf0] }
 0x146   : > { %v2908_v1 = vld [vmem:[#allocation9] sm:$0xf]  ;;  %v3629_v2 = vld [vmem:[#allocation9 + $0xc] sm:$0xf0]  ;;  %v3309_v16 = vor.u32 %v3729_v0, %v3308_v63  ;;  %1794 = vmatpush.bf16.msra.mxu1 %v3053_v8  ;;  %v3715_v53 = vld [vmem:[#allocation9 + $0x2c4] sm:$0xf]  ;;  %v3137_v63 = vor.u32 %v3683_v47, %v3134_v52 }
 0x147   : > { %v4565_v3 = vld [vmem:[#allocation9 + $0x100] sm:$0xf]  ;;  %v3661_v5 = vld [vmem:[#allocation9 + $0x10c] sm:$0xf0]  ;;  %v2909_v23 = vor.u32 %v3629_v2, %v2908_v1  ;;  %1808 = vmatpush.bf16.msra.mxu2 %v3181_v9  ;;  %v3262_v54 = vld [vmem:[#allocation9 + $0x2d0] sm:$0xf0] }
 0x148   : > { %v3164_v6 = vld [vmem:[#allocation9 + $0x200] sm:$0xf]  ;;  %v3693_v7 = vld [vmem:[#allocation9 + $0x20c] sm:$0xf0]  ;;  %v3037_v55 = vor.u32 %v3661_v5, %v4565_v3  ;;  %1822 = vmatpush.bf16.msra.mxu3 %v3309_v16  ;;  %v3747_v59 = vld [vmem:[#allocation9 + $0x3c4] sm:$0xf]  ;;  %v3265_v0 = vor.u32 %v3715_v53, %v3262_v54 }
 0x149   : > { %v3292_v10 = vld [vmem:[#allocation9 + $0x300] sm:$0xf]  ;;  %v3725_v11 = vld [vmem:[#allocation9 + $0x30c] sm:$0xf0]  ;;  %v3165_v27 = vor.u32 %v3693_v7, %v3164_v6  ;;  %1781 = vmatpush.bf16.msra.mxu0 %v2909_v23  ;;  %v3390_v60 = vld [vmem:[#allocation9 + $0x3d0] sm:$0xf0] }
 0x14a   : > { %v966_v18 = vld [vmem:[#allocation2 + $0x30] sm:$0xff]  ;;  %v3293_v39 = vor.u32 %v3725_v11, %v3292_v10  ;;  %v967_v41 = vld [vmem:[#allocation2] sm:$0xff]  ;;  %1795 = vmatpush.bf16.msra.mxu1 %v3037_v55  ;;  %v3647_v1 = vld [vmem:[#allocation9 + $0xa4] sm:$0xf]  ;;  %v3393_v4 = vor.u32 %v3747_v59, %v3390_v60 }
 0x14b   : > { %v969_v21 = vld [vmem:[#allocation2 + $0x10] sm:$0xff]  ;;  %v4572_v33 = vadd.f32 %v976_v20, %v966_v18  ;;  %v971_v42 = vld [vmem:[#allocation2 + $0x20] sm:$0xff]  ;;  %v4580_v48 = vadd.f32 %v977_v26, %v967_v41  ;;  %1809 = vmatpush.bf16.msra.mxu2 %v3165_v27  ;;  %v2990_v2 = vld [vmem:[#allocation9 + $0xb0] sm:$0xf0] }
 0x14c   : > { %v4576_v37 = vadd.f32 %v979_v22, %v969_v21  ;;  %v4582_v49 = vadd.f32 %v977_v26, %v971_v42  ;;  %1823 = vmatpush.bf16.msra.mxu3 %v3293_v39  ;;  %v3679_v3 = vld [vmem:[#allocation9 + $0x1a4] sm:$0xf]  ;;  %v3118_v5 = vld [vmem:[#allocation9 + $0x1b0] sm:$0xf0]  ;;  %v2993_v10 = vor.u32 %v3647_v1, %v2990_v2 }
 0x14d   : > { %v4590_v56 = vpack.c.bf16 %v4574_v36, %v4572_v33  ;;  %1830 = vmatpush.bf16.msrb.mxu0 %v3025_v40  ;;  %v3711_v6 = vld [vmem:[#allocation9 + $0x2a4] sm:$0xf]  ;;  %v3246_v7 = vld [vmem:[#allocation9 + $0x2b0] sm:$0xf0]  ;;  %v3121_v11 = vor.u32 %v3679_v3, %v3118_v5 }
 0x14e   : > { %v4594_v57 = vpack.c.bf16 %v4578_v38, %v4576_v37  ;;  %v4598_v62 = vpack.c.bf16 %v4582_v49, %v4580_v48  ;;  %1844 = vmatpush.bf16.msrb.mxu1 %v3153_v43  ;;  %1810 = vmatmul.bf16.vlgmr.msra.gmra.mxu2 %v4586_v51  ;;  %v3743_v8 = vld [vmem:[#allocation9 + $0x3a4] sm:$0xf]  ;;  %v3374_v9 = vld [vmem:[#allocation9 + $0x3b0] sm:$0xf0]  ;;  %v3249_v12 = vor.u32 %v3711_v6, %v3246_v7 }
 0x14f   : > { %1858 = vmatpush.bf16.msrb.mxu2 %v3281_v44  ;;  %1782 = vmatmul.bf16.vlgmr.msra.gmra.mxu0 %v4590_v56  ;;  %v3643_v13 = vld [vmem:[#allocation9 + $0x84] sm:$0xf]  ;;  %v2974_v14 = vld [vmem:[#allocation9 + $0x90] sm:$0xf0]  ;;  %v3377_v16 = vor.u32 %v3743_v8, %v3374_v9 }
 0x150   : > { %1872 = vmatpush.bf16.msrb.mxu3 %v3409_v50  ;;  %1796 = vmatmul.bf16.vlgmr.msra.gmra.mxu1 %v4598_v62  ;;  %v3675_v15 = vld [vmem:[#allocation9 + $0x184] sm:$0xf]  ;;  %v3102_v17 = vld [vmem:[#allocation9 + $0x190] sm:$0xf0]  ;;  %v2977_v22 = vor.u32 %v3643_v13, %v2974_v14 }
 0x151   : > { %1824 = vmatmul.bf16.vlgmr.msra.gmra.mxu3 %v4594_v57  ;;  %1831 = vmatpush.bf16.msrb.mxu0 %v3009_v61  ;;  %v3707_v18 = vld [vmem:[#allocation9 + $0x284] sm:$0xf]  ;;  %v3230_v19 = vld [vmem:[#allocation9 + $0x290] sm:$0xf0]  ;;  %v3105_v23 = vor.u32 %v3675_v15, %v3102_v17 }
 0x152   : > { %1845 = vmatpush.bf16.msrb.mxu1 %v3137_v63  ;;  %v3739_v20 = vld [vmem:[#allocation9 + $0x384] sm:$0xf]  ;;  %v3358_v21 = vld [vmem:[#allocation9 + $0x390] sm:$0xf0]  ;;  %v3233_v55 = vor.u32 %v3707_v18, %v3230_v19  ;;  %v3028_v18 = vld [vmem:[#allocation9 + $0xe8] sm:$0xf] }
 0x153   : > { %1859 = vmatpush.bf16.msrb.mxu2 %v3265_v0  ;;  %v3639_v58 = vld [vmem:[#allocation9 + $0x64] sm:$0xf]  ;;  %v2958_v24 = vld [vmem:[#allocation9 + $0x70] sm:$0xf0]  ;;  %v3361_v26 = vor.u32 %v3739_v20, %v3358_v21  ;;  %v3658_v19 = vld [vmem:[#allocation9 + $0xf4] sm:$0xf0] }
 0x154   : > { %1873 = vmatpush.bf16.msrb.mxu3 %v3393_v4  ;;  %v3671_v25 = vld [vmem:[#allocation9 + $0x164] sm:$0xf]  ;;  %v3086_v27 = vld [vmem:[#allocation9 + $0x170] sm:$0xf0]  ;;  %v2961_v35 = vor.u32 %v3639_v58, %v2958_v24  ;;  %v3156_v20 = vld [vmem:[#allocation9 + $0x1e8] sm:$0xf] }
 0x155   : > { %1832 = vmatpush.bf16.msrb.mxu0 %v2993_v10  ;;  %v3703_v28 = vld [vmem:[#allocation9 + $0x264] sm:$0xf]  ;;  %v3214_v29 = vld [vmem:[#allocation9 + $0x270] sm:$0xf0]  ;;  %v3089_v39 = vor.u32 %v3671_v25, %v3086_v27  ;;  %v3412_v25 = vld [vmem:[#allocation9 + $0x3e8] sm:$0xf] }
 0x156   : > { %1846 = vmatpush.bf16.msrb.mxu1 %v3121_v11  ;;  %v3735_v30 = vld [vmem:[#allocation9 + $0x364] sm:$0xf]  ;;  %v3342_v34 = vld [vmem:[#allocation9 + $0x370] sm:$0xf0]  ;;  %v3217_v40 = vor.u32 %v3703_v28, %v3214_v29  ;;  %v3029_v28 = vor.u32 %v3658_v19, %v3028_v18  ;;  %v3642_v18 = vld [vmem:[#allocation9 + $0x74] sm:$0xf0] }
 0x157   : > { %1860 = vmatpush.bf16.msrb.mxu2 %v3249_v12  ;;  %v3635_v41 = vld [vmem:[#allocation9 + $0x44] sm:$0xf]  ;;  %v2942_v42 = vld [vmem:[#allocation9 + $0x50] sm:$0xf0]  ;;  %v3345_v44 = vor.u32 %v3735_v30, %v3342_v34  ;;  %v3012_v34 = vld [vmem:[#allocation9 + $0xc8] sm:$0xf] }
 0x158   : > { %1874 = vmatpush.bf16.msrb.mxu3 %v3377_v16  ;;  %v3667_v43 = vld [vmem:[#allocation9 + $0x144] sm:$0xf]  ;;  %v3070_v45 = vld [vmem:[#allocation9 + $0x150] sm:$0xf0]  ;;  %v2945_v53 = vor.u32 %v3635_v41, %v2942_v42  ;;  %v3686_v41 = vld [vmem:[#allocation9 + $0x1d4] sm:$0xf0] }
 0x159   : > { %1833 = vmatpush.bf16.msrb.mxu0 %v2977_v22  ;;  %v3699_v46 = vld [vmem:[#allocation9 + $0x244] sm:$0xf]  ;;  %v3198_v47 = vld [vmem:[#allocation9 + $0x250] sm:$0xf0]  ;;  %v3073_v54 = vor.u32 %v3667_v43, %v3070_v45  ;;  %v3690_v22 = vld [vmem:[#allocation9 + $0x1f4] sm:$0xf0] }
 0x15a   : > { %1847 = vmatpush.bf16.msrb.mxu1 %v3105_v23  ;;  %v3731_v50 = vld [vmem:[#allocation9 + $0x344] sm:$0xf]  ;;  %v3326_v52 = vld [vmem:[#allocation9 + $0x350] sm:$0xf0]  ;;  %v3201_v59 = vor.u32 %v3699_v46, %v3198_v47  ;;  %v3284_v23 = vld [vmem:[#allocation9 + $0x2e8] sm:$0xf]  ;;  %v3157_v29 = vor.u32 %v3690_v22, %v3156_v20 }
 0x15b   : > { %1861 = vmatpush.bf16.msrb.mxu2 %v3233_v55  ;;  %v3631_v60 = vld [vmem:[#allocation9 + $0x24] sm:$0xf]  ;;  %v2926_v61 = vld [vmem:[#allocation9 + $0x30] sm:$0xf0]  ;;  %v3329_v0 = vor.u32 %v3731_v50, %v3326_v52  ;;  %v3722_v55 = vld [vmem:[#allocation9 + $0x2f4] sm:$0xf0] }
 0x15c   : > { %1875 = vmatpush.bf16.msrb.mxu3 %v3361_v26  ;;  %v3663_v63 = vld [vmem:[#allocation9 + $0x124] sm:$0xf]  ;;  %v3054_v1 = vld [vmem:[#allocation9 + $0x130] sm:$0xf0]  ;;  %v2929_v6 = vor.u32 %v3631_v60, %v2926_v61  ;;  %v3754_v26 = vld [vmem:[#allocation9 + $0x3f4] sm:$0xf0]  ;;  %v3285_v30 = vor.u32 %v3722_v55, %v3284_v23 }
 0x15d   : > { %1834 = vmatpush.bf16.msrb.mxu0 %v2961_v35  ;;  %v3695_v2 = vld [vmem:[#allocation9 + $0x224] sm:$0xf]  ;;  %v3182_v3 = vld [vmem:[#allocation9 + $0x230] sm:$0xf0]  ;;  %v3057_v9 = vor.u32 %v3663_v63, %v3054_v1  ;;  %v3654_v35 = vld [vmem:[#allocation9 + $0xd4] sm:$0xf0] }
 0x15e   : > { %1848 = vmatpush.bf16.msrb.mxu1 %v3089_v39  ;;  %v3727_v4 = vld [vmem:[#allocation9 + $0x324] sm:$0xf]  ;;  %v3310_v5 = vld [vmem:[#allocation9 + $0x330] sm:$0xf0]  ;;  %v3185_v10 = vor.u32 %v3695_v2, %v3182_v3  ;;  %v3140_v39 = vld [vmem:[#allocation9 + $0x1c8] sm:$0xf]  ;;  %v3013_v46 = vor.u32 %v3654_v35, %v3012_v34 }
 0x15f   : > { %1862 = vmatpush.bf16.msrb.mxu2 %v3217_v40  ;;  %v3627_v7 = vld [vmem:[#allocation9 + $0x4] sm:$0xf]  ;;  %v2910_v8 = vld [vmem:[#allocation9 + $0x10] sm:$0xf0]  ;;  %v3313_v14 = vor.u32 %v3727_v4, %v3310_v5  ;;  %v3413_v40 = vor.u32 %v3754_v26, %v3412_v25  ;;  %v3268_v42 = vld [vmem:[#allocation9 + $0x2c8] sm:$0xf]  ;;  %v3141_v47 = vor.u32 %v3686_v41, %v3140_v39 }
 0x160   : > { %1876 = vmatpush.bf16.msrb.mxu3 %v3345_v44  ;;  %v3659_v11 = vld [vmem:[#allocation9 + $0x104] sm:$0xf]  ;;  %v3038_v12 = vld [vmem:[#allocation9 + $0x110] sm:$0xf0]  ;;  %v2913_v21 = vor.u32 %v3627_v7, %v2910_v8  ;;  %v3718_v43 = vld [vmem:[#allocation9 + $0x2d4] sm:$0xf0] }
 0x161   : > { %1835 = vmatpush.bf16.msrb.mxu0 %v2945_v53  ;;  %v3691_v13 = vld [vmem:[#allocation9 + $0x204] sm:$0xf]  ;;  %v3166_v15 = vld [vmem:[#allocation9 + $0x210] sm:$0xf0]  ;;  %v3041_v58 = vor.u32 %v3659_v11, %v3038_v12  ;;  %v3396_v44 = vld [vmem:[#allocation9 + $0x3c8] sm:$0xf]  ;;  %v3269_v50 = vor.u32 %v3718_v43, %v3268_v42 }
 0x162   : > { %1849 = vmatpush.bf16.msrb.mxu1 %v3073_v54  ;;  %v3723_v16 = vld [vmem:[#allocation9 + $0x304] sm:$0xf]  ;;  %v3294_v17 = vld [vmem:[#allocation9 + $0x310] sm:$0xf0]  ;;  %v3169_v24 = vor.u32 %v3691_v13, %v3166_v15  ;;  %v3750_v45 = vld [vmem:[#allocation9 + $0x3d4] sm:$0xf0] }
 0x163   : > { %1863 = vmatpush.bf16.msrb.mxu2 %v3201_v59  ;;  %v3297_v27 = vor.u32 %v3723_v16, %v3294_v17  ;;  %v2996_v52 = vld [vmem:[#allocation9 + $0xa8] sm:$0xf]  ;;  %v3650_v53 = vld [vmem:[#allocation9 + $0xb4] sm:$0xf0]  ;;  %v3397_v59 = vor.u32 %v3750_v45, %v3396_v44 }
 0x164   : > { %1877 = vmatpush.bf16.msrb.mxu3 %v3329_v0  ;;  %v3124_v54 = vld [vmem:[#allocation9 + $0x1a8] sm:$0xf]  ;;  %v3682_v60 = vld [vmem:[#allocation9 + $0x1b4] sm:$0xf0]  ;;  %v2997_v2 = vor.u32 %v3650_v53, %v2996_v52 }
 0x165   : > { %1836 = vmatpush.bf16.msrb.mxu0 %v2929_v6  ;;  %v3252_v61 = vld [vmem:[#allocation9 + $0x2a8] sm:$0xf]  ;;  %v3714_v63 = vld [vmem:[#allocation9 + $0x2b4] sm:$0xf0]  ;;  %v3125_v3 = vor.u32 %v3682_v60, %v3124_v54 }
 0x166   : > { %1850 = vmatpush.bf16.msrb.mxu1 %v3057_v9  ;;  %v3380_v0 = vld [vmem:[#allocation9 + $0x3a8] sm:$0xf]  ;;  %v3746_v1 = vld [vmem:[#allocation9 + $0x3b4] sm:$0xf0]  ;;  %v3253_v4 = vor.u32 %v3714_v63, %v3252_v61 }
 0x167   : > { %1864 = vmatpush.bf16.msrb.mxu2 %v3185_v10  ;;  %v2980_v5 = vld [vmem:[#allocation9 + $0x88] sm:$0xf]  ;;  %v3646_v6 = vld [vmem:[#allocation9 + $0x94] sm:$0xf0]  ;;  %v3381_v8 = vor.u32 %v3746_v1, %v3380_v0 }
 0x168   : > { %1878 = vmatpush.bf16.msrb.mxu3 %v3313_v14  ;;  %v3108_v7 = vld [vmem:[#allocation9 + $0x188] sm:$0xf]  ;;  %v3678_v9 = vld [vmem:[#allocation9 + $0x194] sm:$0xf0]  ;;  %v2981_v14 = vor.u32 %v3646_v6, %v2980_v5 }
 0x169   : > { %1837 = vmatpush.bf16.msrb.mxu0 %v2913_v21  ;;  %v3236_v10 = vld [vmem:[#allocation9 + $0x288] sm:$0xf]  ;;  %v3710_v11 = vld [vmem:[#allocation9 + $0x294] sm:$0xf0]  ;;  %v3109_v15 = vor.u32 %v3678_v9, %v3108_v7 }
 0x16a   : > { %1851 = vmatpush.bf16.msrb.mxu1 %v3041_v58  ;;  %v3364_v12 = vld [vmem:[#allocation9 + $0x388] sm:$0xf]  ;;  %v3742_v13 = vld [vmem:[#allocation9 + $0x394] sm:$0xf0]  ;;  %v3237_v16 = vor.u32 %v3710_v11, %v3236_v10  ;;  %v3656_v10 = vld [vmem:[#allocation9 + $0xec] sm:$0xf] }
 0x16b   : > { %1865 = vmatpush.bf16.msrb.mxu2 %v3169_v24  ;;  %v2964_v17 = vld [vmem:[#allocation9 + $0x68] sm:$0xf]  ;;  %v3365_v20 = vor.u32 %v3742_v13, %v3364_v12  ;;  %v3674_v21 = vld [vmem:[#allocation9 + $0x174] sm:$0xf0]  ;;  %v3030_v11 = vld [vmem:[#allocation9 + $0xf8] sm:$0xf0] }
 0x16c   : > { %1879 = vmatpush.bf16.msrb.mxu3 %v3297_v27  ;;  %1838 = vmatmul.bf16.vlgmr.msrb.gmra.mxu0 %v4590_v56  ;;  %v3092_v19 = vld [vmem:[#allocation9 + $0x168] sm:$0xf]  ;;  %v3706_v23 = vld [vmem:[#allocation9 + $0x274] sm:$0xf0]  ;;  %v2965_v24 = vor.u32 %v3642_v18, %v2964_v17  ;;  %v3688_v12 = vld [vmem:[#allocation9 + $0x1ec] sm:$0xf] }
 0x16d   : > { %1886 = vmatpush.bf16.msra.mxu0 %v3029_v28  ;;  %1852 = vmatmul.bf16.vlgmr.msrb.gmra.mxu1 %v4598_v62  ;;  %v3220_v22 = vld [vmem:[#allocation9 + $0x268] sm:$0xf]  ;;  %v3738_v58 = vld [vmem:[#allocation9 + $0x374] sm:$0xf0]  ;;  %v3093_v25 = vor.u32 %v3674_v21, %v3092_v19  ;;  %v3752_v19 = vld [vmem:[#allocation9 + $0x3ec] sm:$0xf] }
 0x16e   : > { %1900 = vmatpush.bf16.msra.mxu1 %v3157_v29  ;;  %1866 = vmatmul.bf16.vlgmr.msrb.gmra.mxu2 %v4586_v51  ;;  %v3348_v55 = vld [vmem:[#allocation9 + $0x368] sm:$0xf]  ;;  %v3221_v26 = vor.u32 %v3706_v23, %v3220_v22  ;;  %v3638_v28 = vld [vmem:[#allocation9 + $0x54] sm:$0xf0]  ;;  %v3033_v22 = vor.u32 %v3656_v10, %v3030_v11  ;;  %v2966_v10 = vld [vmem:[#allocation9 + $0x78] sm:$0xf0] }
 0x16f   : > { %1914 = vmatpush.bf16.msra.mxu2 %v3285_v30  ;;  %1880 = vmatmul.bf16.vlgmr.msrb.gmra.mxu3 %v4594_v57  ;;  %v2948_v27 = vld [vmem:[#allocation9 + $0x48] sm:$0xf]  ;;  %v3349_v30 = vor.u32 %v3738_v58, %v3348_v55  ;;  %v3670_v34 = vld [vmem:[#allocation9 + $0x154] sm:$0xf0]  ;;  %v3652_v58 = vld [vmem:[#allocation9 + $0xcc] sm:$0xf] }
 0x170   : > { %1928 = vmatpush.bf16.msra.mxu3 %v3413_v40  ;;  %v3076_v29 = vld [vmem:[#allocation9 + $0x148] sm:$0xf]  ;;  %v3702_v39 = vld [vmem:[#allocation9 + $0x254] sm:$0xf0]  ;;  %v2949_v42 = vor.u32 %v3638_v28, %v2948_v27  ;;  %v3142_v27 = vld [vmem:[#allocation9 + $0x1d8] sm:$0xf0] }
 0x171   : > { %1887 = vmatpush.bf16.msra.mxu0 %v3013_v46  ;;  %v3204_v35 = vld [vmem:[#allocation9 + $0x248] sm:$0xf]  ;;  %v3734_v41 = vld [vmem:[#allocation9 + $0x354] sm:$0xf0]  ;;  %v3077_v43 = vor.u32 %v3670_v34, %v3076_v29  ;;  %v3716_v28 = vld [vmem:[#allocation9 + $0x2cc] sm:$0xf] }
 0x172   : > { %1901 = vmatpush.bf16.msra.mxu1 %v3141_v47  ;;  %v3332_v40 = vld [vmem:[#allocation9 + $0x348] sm:$0xf]  ;;  %v3205_v44 = vor.u32 %v3702_v39, %v3204_v35  ;;  %v3634_v46 = vld [vmem:[#allocation9 + $0x34] sm:$0xf0]  ;;  %v3270_v29 = vld [vmem:[#allocation9 + $0x2d8] sm:$0xf0] }
 0x173   : > { %1915 = vmatpush.bf16.msra.mxu2 %v3269_v50  ;;  %v2932_v45 = vld [vmem:[#allocation9 + $0x28] sm:$0xf]  ;;  %v3333_v50 = vor.u32 %v3734_v41, %v3332_v40  ;;  %v3666_v52 = vld [vmem:[#allocation9 + $0x134] sm:$0xf0]  ;;  %v3398_v34 = vld [vmem:[#allocation9 + $0x3d8] sm:$0xf0]  ;;  %v3273_v40 = vor.u32 %v3716_v28, %v3270_v29 }
 0x174   : > { %1929 = vmatpush.bf16.msra.mxu3 %v3397_v59  ;;  %v3060_v47 = vld [vmem:[#allocation9 + $0x128] sm:$0xf]  ;;  %v3698_v54 = vld [vmem:[#allocation9 + $0x234] sm:$0xf0]  ;;  %v2933_v61 = vor.u32 %v3634_v46, %v2932_v45  ;;  %v3648_v41 = vld [vmem:[#allocation9 + $0xac] sm:$0xf] }
 0x175   : > { %1888 = vmatpush.bf16.msra.mxu0 %v2997_v2  ;;  %v3188_v53 = vld [vmem:[#allocation9 + $0x228] sm:$0xf]  ;;  %v3730_v60 = vld [vmem:[#allocation9 + $0x334] sm:$0xf0]  ;;  %v3061_v1 = vor.u32 %v3666_v52, %v3060_v47  ;;  %v3126_v45 = vld [vmem:[#allocation9 + $0x1b8] sm:$0xf0] }
 0x176   : > { %1902 = vmatpush.bf16.msra.mxu1 %v3125_v3  ;;  %v3316_v59 = vld [vmem:[#allocation9 + $0x328] sm:$0xf]  ;;  %v3630_v0 = vld [vmem:[#allocation9 + $0x14] sm:$0xf0]  ;;  %v3189_v2 = vor.u32 %v3698_v54, %v3188_v53  ;;  %v3712_v46 = vld [vmem:[#allocation9 + $0x2ac] sm:$0xf] }
 0x177   : > { %1916 = vmatpush.bf16.msra.mxu2 %v3253_v4  ;;  %v2916_v63 = vld [vmem:[#allocation9 + $0x8] sm:$0xf]  ;;  %v3662_v4 = vld [vmem:[#allocation9 + $0x114] sm:$0xf0]  ;;  %v3317_v6 = vor.u32 %v3730_v60, %v3316_v59  ;;  %v3254_v47 = vld [vmem:[#allocation9 + $0x2b8] sm:$0xf0] }
 0x178   : > { %1930 = vmatpush.bf16.msra.mxu3 %v3381_v8  ;;  %v3044_v3 = vld [vmem:[#allocation9 + $0x108] sm:$0xf]  ;;  %v3694_v7 = vld [vmem:[#allocation9 + $0x214] sm:$0xf0]  ;;  %v2917_v13 = vor.u32 %v3630_v0, %v2916_v63  ;;  %v3382_v52 = vld [vmem:[#allocation9 + $0x3b8] sm:$0xf0]  ;;  %v3257_v59 = vor.u32 %v3712_v46, %v3254_v47 }
 0x179   : > { %1889 = vmatpush.bf16.msra.mxu0 %v2981_v14  ;;  %v3172_v5 = vld [vmem:[#allocation9 + $0x208] sm:$0xf]  ;;  %v3726_v9 = vld [vmem:[#allocation9 + $0x314] sm:$0xf0]  ;;  %v3158_v14 = vld [vmem:[#allocation9 + $0x1f8] sm:$0xf0]  ;;  %v3045_v17 = vor.u32 %v3662_v4, %v3044_v3 }
 0x17a   : > { %1903 = vmatpush.bf16.msra.mxu1 %v3109_v15  ;;  %v3300_v8 = vld [vmem:[#allocation9 + $0x308] sm:$0xf]  ;;  %v3720_v15 = vld [vmem:[#allocation9 + $0x2ec] sm:$0xf]  ;;  %v3173_v18 = vor.u32 %v3694_v7, %v3172_v5  ;;  %v3161_v23 = vor.u32 %v3688_v12, %v3158_v14  ;;  %v3238_v3 = vld [vmem:[#allocation9 + $0x298] sm:$0xf0] }
 0x17b   : > { %1917 = vmatpush.bf16.msra.mxu2 %v3237_v16  ;;  %v3286_v16 = vld [vmem:[#allocation9 + $0x2f8] sm:$0xf0]  ;;  %v3301_v21 = vor.u32 %v3726_v9, %v3300_v8  ;;  %v3644_v60 = vld [vmem:[#allocation9 + $0x8c] sm:$0xf] }
 0x17c   : > { %1931 = vmatpush.bf16.msra.mxu3 %v3365_v20  ;;  %v3414_v20 = vld [vmem:[#allocation9 + $0x3f8] sm:$0xf0]  ;;  %v3289_v55 = vor.u32 %v3720_v15, %v3286_v16  ;;  %v3676_v63 = vld [vmem:[#allocation9 + $0x18c] sm:$0xf] }
 0x17d   : > { %1890 = vmatpush.bf16.msra.mxu0 %v2965_v24  ;;  %v3014_v24 = vld [vmem:[#allocation9 + $0xd8] sm:$0xf0]  ;;  %v3740_v4 = vld [vmem:[#allocation9 + $0x38c] sm:$0xf] }
 0x17e   : > { %1904 = vmatpush.bf16.msra.mxu1 %v3093_v25  ;;  %v3684_v25 = vld [vmem:[#allocation9 + $0x1cc] sm:$0xf]  ;;  %v3017_v35 = vor.u32 %v3652_v58, %v3014_v24  ;;  %v3366_v5 = vld [vmem:[#allocation9 + $0x398] sm:$0xf0] }
 0x17f   : > { %1918 = vmatpush.bf16.msra.mxu2 %v3221_v26  ;;  %v3417_v26 = vor.u32 %v3752_v19, %v3414_v20  ;;  %v3145_v39 = vor.u32 %v3684_v25, %v3142_v27  ;;  %v3640_v9 = vld [vmem:[#allocation9 + $0x6c] sm:$0xf]  ;;  %v3369_v12 = vor.u32 %v3740_v4, %v3366_v5  ;;  %v3222_v15 = vld [vmem:[#allocation9 + $0x278] sm:$0xf0] }
 0x180   : > { %1932 = vmatpush.bf16.msra.mxu3 %v3349_v30  ;;  %v3748_v30 = vld [vmem:[#allocation9 + $0x3cc] sm:$0xf]  ;;  %v3078_v58 = vld [vmem:[#allocation9 + $0x158] sm:$0xf0] }
 0x181   : > { %1891 = vmatpush.bf16.msra.mxu0 %v2949_v42  ;;  %v2998_v42 = vld [vmem:[#allocation9 + $0xb8] sm:$0xf0]  ;;  %v3672_v11 = vld [vmem:[#allocation9 + $0x16c] sm:$0xf] }
 0x182   : > { %1905 = vmatpush.bf16.msra.mxu1 %v3077_v43  ;;  %v3680_v43 = vld [vmem:[#allocation9 + $0x1ac] sm:$0xf]  ;;  %v3001_v53 = vor.u32 %v3648_v41, %v2998_v42  ;;  %v3206_v25 = vld [vmem:[#allocation9 + $0x258] sm:$0xf0] }
 0x183   : > { %1919 = vmatpush.bf16.msra.mxu2 %v3205_v44  ;;  %v3401_v44 = vor.u32 %v3748_v30, %v3398_v34  ;;  %v3129_v54 = vor.u32 %v3680_v43, %v3126_v45  ;;  %v3704_v14 = vld [vmem:[#allocation9 + $0x26c] sm:$0xf]  ;;  %v3334_v27 = vld [vmem:[#allocation9 + $0x358] sm:$0xf0] }
 0x184   : > { %1933 = vmatpush.bf16.msra.mxu3 %v3333_v50  ;;  %v3744_v50 = vld [vmem:[#allocation9 + $0x3ac] sm:$0xf]  ;;  %v3225_v20 = vor.u32 %v3704_v14, %v3222_v15  ;;  %v3062_v41 = vld [vmem:[#allocation9 + $0x138] sm:$0xf0] }
 0x185   : > { %1892 = vmatpush.bf16.msra.mxu0 %v2933_v61  ;;  %v2982_v61 = vld [vmem:[#allocation9 + $0x98] sm:$0xf0]  ;;  %v3385_v0 = vor.u32 %v3744_v50, %v3382_v52  ;;  %v3736_v16 = vld [vmem:[#allocation9 + $0x36c] sm:$0xf] }
 0x186   : > { %1906 = vmatpush.bf16.msra.mxu1 %v3061_v1  ;;  %v3110_v1 = vld [vmem:[#allocation9 + $0x198] sm:$0xf0]  ;;  %v3700_v24 = vld [vmem:[#allocation9 + $0x24c] sm:$0xf] }
 0x187   : > { %1920 = vmatpush.bf16.msra.mxu2 %v3189_v2  ;;  %v3708_v2 = vld [vmem:[#allocation9 + $0x28c] sm:$0xf]  ;;  %v3113_v7 = vor.u32 %v3676_v63, %v3110_v1  ;;  %v3209_v30 = vor.u32 %v3700_v24, %v3206_v25  ;;  %v3190_v43 = vld [vmem:[#allocation9 + $0x238] sm:$0xf0] }
 0x188   : > { %1934 = vmatpush.bf16.msra.mxu3 %v3317_v6  ;;  %v2985_v6 = vor.u32 %v3644_v60, %v2982_v61  ;;  %v3241_v8 = vor.u32 %v3708_v2, %v3238_v3  ;;  %v3632_v34 = vld [vmem:[#allocation9 + $0x2c] sm:$0xf]  ;;  %v3318_v45 = vld [vmem:[#allocation9 + $0x338] sm:$0xf0] }
 0x189   : > { %1893 = vmatpush.bf16.msra.mxu0 %v2917_v13  ;;  %v3094_v13 = vld [vmem:[#allocation9 + $0x178] sm:$0xf0]  ;;  %v3696_v42 = vld [vmem:[#allocation9 + $0x22c] sm:$0xf] }
 0x18a   : > { %1907 = vmatpush.bf16.msra.mxu1 %v3045_v17  ;;  %v3350_v17 = vld [vmem:[#allocation9 + $0x378] sm:$0xf0]  ;;  %v3097_v19 = vor.u32 %v3672_v11, %v3094_v13  ;;  %v3193_v50 = vor.u32 %v3696_v42, %v3190_v43  ;;  %v3628_v52 = vld [vmem:[#allocation9 + $0xc] sm:$0xf] }
 0x18b   : > { %1921 = vmatpush.bf16.msra.mxu2 %v3173_v18  ;;  %v2969_v18 = vor.u32 %v3640_v9, %v2966_v10  ;;  %v3046_v60 = vld [vmem:[#allocation9 + $0x118] sm:$0xf0]  ;;  %v3692_v61 = vld [vmem:[#allocation9 + $0x20c] sm:$0xf] }
 0x18c   : > { %1935 = vmatpush.bf16.msra.mxu3 %v3301_v21  ;;  %1894 = vmatmul.bf16.vlgmr.msra.gmra.mxu0 %v4590_v56  ;;  %v3636_v21 = vld [vmem:[#allocation9 + $0x4c] sm:$0xf]  ;;  %v3174_v63 = vld [vmem:[#allocation9 + $0x218] sm:$0xf0] }
 0x18d   : > { %1942 = vmatpush.bf16.msrb.mxu0 %v3033_v22  ;;  %1908 = vmatmul.bf16.vlgmr.msra.gmra.mxu1 %v4598_v62  ;;  %v2950_v22 = vld [vmem:[#allocation9 + $0x58] sm:$0xf0]  ;;  %v3177_v4 = vor.u32 %v3692_v61, %v3174_v63  ;;  %v3760_v10 = vld [vmem:[#allocation12 + $0x28] sm:$0xff] }
 0x18e   : > { %1956 = vmatpush.bf16.msrb.mxu1 %v3161_v23  ;;  %1922 = vmatmul.bf16.vlgmr.msra.gmra.mxu2 %v4586_v51  ;;  %v3668_v23 = vld [vmem:[#allocation9 + $0x14c] sm:$0xf]  ;;  %v2953_v28 = vor.u32 %v3636_v21, %v2950_v22  ;;  %v3302_v1 = vld [vmem:[#allocation9 + $0x318] sm:$0xf0] }
 0x18f   : > { %1970 = vmatpush.bf16.msrb.mxu2 %v3289_v55  ;;  %1936 = vmatmul.bf16.vlgmr.msra.gmra.mxu3 %v4594_v57  ;;  %v3353_v55 = vor.u32 %v3736_v16, %v3350_v17  ;;  %v3081_v29 = vor.u32 %v3668_v23, %v3078_v58  ;;  %v3766_v61 = vld [vmem:[#allocation12 + $0x58] sm:$0xff] }
 0x190   : > { %1984 = vmatpush.bf16.msrb.mxu3 %v3417_v26  ;;  %v3732_v26 = vld [vmem:[#allocation9 + $0x34c] sm:$0xf] }
 0x191   : > { %1943 = vmatpush.bf16.msrb.mxu0 %v3017_v35  ;;  %v2934_v35 = vld [vmem:[#allocation9 + $0x38] sm:$0xf0] }
 0x192   : > { %1957 = vmatpush.bf16.msrb.mxu1 %v3145_v39  ;;  %v3664_v39 = vld [vmem:[#allocation9 + $0x12c] sm:$0xf]  ;;  %v2937_v46 = vor.u32 %v3632_v34, %v2934_v35  ;;  %v3769_v34 = vld [vmem:[#allocation12 + $0x70] sm:$0xff] }
 0x193   : > { %1971 = vmatpush.bf16.msrb.mxu2 %v3273_v40  ;;  %v3337_v40 = vor.u32 %v3732_v26, %v3334_v27  ;;  %v3065_v47 = vor.u32 %v3664_v39, %v3062_v41  ;;  %v3755_v26 = vld [vmem:[#allocation12] sm:$0xff]  ;;  %v3768_v39 = vld [vmem:[#allocation12 + $0x68] sm:$0xff] }
 0x194   : > { %1985 = vmatpush.bf16.msrb.mxu3 %v3401_v44  ;;  %v3728_v44 = vld [vmem:[#allocation9 + $0x32c] sm:$0xf] }
 0x195   : > { %1944 = vmatpush.bf16.msrb.mxu0 %v3001_v53  ;;  %v2918_v53 = vld [vmem:[#allocation9 + $0x18] sm:$0xf0] }
 0x196   : > { %1958 = vmatpush.bf16.msrb.mxu1 %v3129_v54  ;;  %v3660_v54 = vld [vmem:[#allocation9 + $0x10c] sm:$0xf]  ;;  %v2921_v2 = vor.u32 %v3628_v52, %v2918_v53 }
 0x197   : > { %1972 = vmatpush.bf16.msrb.mxu2 %v3257_v59  ;;  %v3321_v59 = vor.u32 %v3728_v44, %v3318_v45  ;;  %v3049_v3 = vor.u32 %v3660_v54, %v3046_v60 }
 0x198   : > { %1986 = vmatpush.bf16.msrb.mxu3 %v3385_v0  ;;  %v3724_v0 = vld [vmem:[#allocation9 + $0x30c] sm:$0xf] }
 0x199   : > { %1945 = vmatpush.bf16.msrb.mxu0 %v2985_v6  ;;  %v3305_v5 = vor.u32 %v3724_v0, %v3302_v1  ;;  %v3762_v6 = vld [vmem:[#allocation12 + $0x38] sm:$0xff] }
 0x19a   : > { %1959 = vmatpush.bf16.msrb.mxu1 %v3113_v7  ;;  %v3761_v7 = vld [vmem:[#allocation12 + $0x30] sm:$0xff] }
 0x19b   : > { %1973 = vmatpush.bf16.msrb.mxu2 %v3241_v8  ;;  %v4616_v8 = vld [vmem:[#allocation11] sm:$0xf] }
 0x19c   : > { %1987 = vmatpush.bf16.msrb.mxu3 %v3369_v12  ;;  %v1126_v9 = vperm.slane %v4616_v8, 0  ;;  %v1127_v42 = vperm.slane %v4616_v8, 1 }
 0x19d   : > { %1946 = vmatpush.bf16.msrb.mxu0 %v2969_v18 }
 0x19e   : > { %1960 = vmatpush.bf16.msrb.mxu1 %v3097_v19 }
 0x19f   : > { %1974 = vmatpush.bf16.msrb.mxu2 %v3225_v20  ;;  %v3757_v20 = vld [vmem:[#allocation12 + $0x10] sm:$0xff] }
 0x1a0   : > { %1988 = vmatpush.bf16.msrb.mxu3 %v3353_v55  ;;  %v3756_v55 = vld [vmem:[#allocation12 + $0x8] sm:$0xff] }
 0x1a1   : > { %1947 = vmatpush.bf16.msrb.mxu0 %v2953_v28 }
 0x1a2   : > { %1961 = vmatpush.bf16.msrb.mxu1 %v3081_v29  ;;  %v3770_v29 = vld [vmem:[#allocation12 + $0x78] sm:$0xff] }
 0x1a3   : > { %1975 = vmatpush.bf16.msrb.mxu2 %v3209_v30 }
 0x1a4   : > { %1989 = vmatpush.bf16.msrb.mxu3 %v3337_v40 }
 0x1a5   : > { %1948 = vmatpush.bf16.msrb.mxu0 %v2937_v46  ;;  %v3767_v46 = vld [vmem:[#allocation12 + $0x60] sm:$0xff] }
 0x1a6   : > { %1962 = vmatpush.bf16.msrb.mxu1 %v3065_v47 }
 0x1a7   : > { %1976 = vmatpush.bf16.msrb.mxu2 %v3193_v50 }
 0x1a8   : > { %1990 = vmatpush.bf16.msrb.mxu3 %v3321_v59 }
 0x1a9   : > { %1949 = vmatpush.bf16.msrb.mxu0 %v2921_v2 }
 0x1aa   : > { %1963 = vmatpush.bf16.msrb.mxu1 %v3049_v3 }
 0x1ab   : > { %1977 = vmatpush.bf16.msrb.mxu2 %v3177_v4 }
 0x1ac   : > { %1991 = vmatpush.bf16.msrb.mxu3 %v3305_v5  ;;  %1950 = vmatmul.bf16.vlgmr.msrb.gmra.mxu0 %v4590_v56  ;;  %v3759_v56 = vld [vmem:[#allocation12 + $0x20] sm:$0xff] }
 0x1ad   : > { %1964 = vmatmul.bf16.vlgmr.msrb.gmra.mxu1 %v4598_v62  ;;  %2422 = vmatpush.bf16.msra.mxu0 %v3762_v6 }
 0x1ae   : > { %1978 = vmatmul.bf16.vlgmr.msrb.gmra.mxu2 %v4586_v51  ;;  %v3758_v51 = vld [vmem:[#allocation12 + $0x18] sm:$0xff]  ;;  %2436 = vmatpush.bf16.msra.mxu1 %v3770_v29 }
 0x1af   : > { %1992 = vmatmul.bf16.vlgmr.msrb.gmra.mxu3 %v4594_v57 }
 0x1b1   : > { %2423 = vmatpush.bf16.msra.mxu0 %v3761_v7 }
 0x1b2   : > { %2437 = vmatpush.bf16.msra.mxu1 %v3769_v34 }
 0x1b5   : > { %2424 = vmatpush.bf16.msra.mxu0 %v3760_v10 }
 0x1b6   : > { %2438 = vmatpush.bf16.msra.mxu1 %v3768_v39  ;;  %v3776_v39 = vld [vmem:[#allocation12 + $0xa8] sm:$0xff] }
 0x1b9   : > { %2425 = vmatpush.bf16.msra.mxu0 %v3759_v56  ;;  %v3765_v56 = vld [vmem:[#allocation12 + $0x50] sm:$0xff] }
 0x1ba   : > { %2439 = vmatpush.bf16.msra.mxu1 %v3767_v46 }
 0x1bd   : > { %2426 = vmatpush.bf16.msra.mxu0 %v3758_v51 }
 0x1be   : > { %2440 = vmatpush.bf16.msra.mxu1 %v3766_v61 }
 0x1c1   : > { %2427 = vmatpush.bf16.msra.mxu0 %v3757_v20 }
 0x1c2   : > { %2441 = vmatpush.bf16.msra.mxu1 %v3765_v56 }
 0x1c5   : > { %2428 = vmatpush.bf16.msra.mxu0 %v3756_v55 }
 0x1c9   : > { %2429 = vmatpush.bf16.msra.mxu0 %v3755_v26  ;;  %v3763_v26 = vld [vmem:[#allocation12 + $0x40] sm:$0xff] }
 0x1cc   : > { %v1783_v11 = vpop.f32.mrf.mxu0 }
 0x1cd   : > { %v1784_v12 = vadd.f32 %v1783_v11, %v1126_v9  ;;  %v1797_v13 = vpop.f32.mrf.mxu1 }
 0x1cf   : > { %v1798_v14 = vadd.f32 %v1797_v13, %v1784_v12 }
 0x1d1   : > { %v1811_v62 = vpop.f32.mrf.mxu2 }
 0x1d2   : > { %v1812_v15 = vadd.f32 %v1811_v62, %v1798_v14 }
 0x1d4   : > { %v1825_v57 = vpop.f32.mrf.mxu3  ;;  %v1785_v17 = vpop.f32.mrf.mxu0 }
 0x1d5   : > { %v1826_v16 = vadd.f32 %v1825_v57, %v1812_v15  ;;  %v1786_v18 = vadd.f32 %v1785_v17, %v1126_v9  ;;  %v1799_v19 = vpop.f32.mrf.mxu1 }
 0x1d7   : > { %v3418_v21 = vmul.f32 -1.442695, %v1826_v16  ;;  %v1800_v22 = vadd.f32 %v1799_v19, %v1786_v18  ;;  %v3764_v19 = vld [vmem:[#allocation12 + $0x48] sm:$0xff] }
 0x1d8   : > { %2442 = vmatpush.bf16.msra.mxu1 %v3764_v19 }
 0x1d9   : > { %3906 = vpow2.f32 %v3418_v21  ;;  %v1813_v23 = vpop.f32.mrf.mxu2 }
 0x1da   : > { %v1814_v58 = vadd.f32 %v1813_v23, %v1800_v22 }
 0x1dc   : > { %v1827_v24 = vpop.f32.mrf.mxu3  ;;  %2443 = vmatpush.bf16.msra.mxu1 %v3763_v26  ;;  %v3786_v26 = vld [vmem:[#allocation12 + $0xf8] sm:$0xff] }
 0x1dd   : > { %v1828_v25 = vadd.f32 %v1827_v24, %v1814_v58  ;;  %2464 = vmatpush.bf16.msra.mxu3 %v3786_v26 }
 0x1df   : > { %v3907_v27 = vpop.eup %3906  ;;  %v3422_v28 = vmul.f32 -1.442695, %v1828_v25 }
 0x1e0   : > { %v2022_v30 = vadd.f32 1.0, %v3907_v27  ;;  %v3778_v27 = vld [vmem:[#allocation12 + $0xb8] sm:$0xff] }
 0x1e1   : > { %3908 = vpow2.f32 %v3422_v28  ;;  %2450 = vmatpush.bf16.msra.mxu2 %v3778_v27 }
 0x1e2   : > { %3910 = vrcp.f32 %v2022_v30  ;;  %vm2035_vm0 = vweird.f32 %v2022_v30  ;;  %v2039_v53 = vand.u32 2147483647, %v2022_v30  ;;  %v2041_v59 = vand.u32 2147483648, %v2022_v30 }
 0x1e4   : > { %vm4624_vm3 = vcmp.eq.f32.partialorder %v2039_v53, 8.507059e+37  ;;  %v2042_v6 = vor.u32 1.1754944e-38, %v2041_v59  ;;  %v3774_v59 = vld [vmem:[#allocation12 + $0x98] sm:$0xff] }
 0x1e7   : > { %v3909_v35 = vpop.eup %3908 }
 0x1e8   : > { %v3911_v40 = vpop.eup %3910  ;;  %v2026_v41 = vadd.f32 1.0, %v3909_v35  ;;  %v3777_v35 = vld [vmem:[#allocation12 + $0xb0] sm:$0xff] }
 0x1e9   : > { %v2031_v43 = vmul.f32 %v3911_v40, %v2022_v30  ;;  %v1839_v45 = vpop.f32.mrf.mxu0  ;;  %vm2036_vm1 = vweird.f32 %v3911_v40  ;;  %2451 = vmatpush.bf16.msra.mxu2 %v3777_v35  ;;  %v3784_v35 = vld [vmem:[#allocation12 + $0xe8] sm:$0xff] }
 0x1ea   : > { %3912 = vrcp.f32 %v2026_v41  ;;  %v1840_v47 = vadd.f32 %v1839_v45, %v1127_v42  ;;  %v1853_v50 = vpop.f32.mrf.mxu1  ;;  %vm4620_vm2 = vmor %vm2035_vm0, %vm2036_vm1  ;;  %vm2095_vm4 = vweird.f32 %v2026_v41  ;;  %v2099_v7 = vand.u32 2147483647, %v2026_v41 }
 0x1eb   : > { %v2032_v44 = vsub.f32 1.0, %v2031_v43  ;;  %v2101_v9 = vand.u32 2147483648, %v2026_v41  ;;  %v3775_v43 = vld [vmem:[#allocation12 + $0xa0] sm:$0xff] }
 0x1ec   : > { %v1854_v54 = vadd.f32 %v1853_v50, %v1840_v47  ;;  %vm2100_vm7 = vcmp.eq.f32.partialorder %v2099_v7, 8.507059e+37 }
 0x1ed   : > { %v2033_v52 = vmul.f32 %v3911_v40, %v2032_v44  ;;  %v2102_v17 = vor.u32 1.1754944e-38, %v2101_v9  ;;  %2452 = vmatpush.bf16.msra.mxu2 %v3776_v39  ;;  %v3773_v9 = vld [vmem:[#allocation12 + $0x90] sm:$0xff] }
 0x1ef   : > { %v2034_v60 = vadd.f32 %v3911_v40, %v2033_v52 }
 0x1f0   : > { %v3913_v63 = vpop.eup %3912 }
 0x1f1   : > { %v1867_v0 = vpop.f32.mrf.mxu2  ;;  %v2091_v2 = vmul.f32 %v3913_v63, %v2026_v41  ;;  %v1841_v12 = vpop.f32.mrf.mxu0  ;;  %v2038_v13 = vsel %vm4620_vm2, %v3911_v40, %v2034_v60  ;;  %vm2096_vm5 = vweird.f32 %v3913_v63  ;;  %2453 = vmatpush.bf16.msra.mxu2 %v3775_v43 }
 0x1f2   : > { %v1868_v3 = vadd.f32 %v1867_v0, %v1854_v54  ;;  %v1881_v4 = vpop.f32.mrf.mxu3  ;;  %v1842_v14 = vadd.f32 %v1841_v12, %v1127_v42  ;;  %v1855_v62 = vpop.f32.mrf.mxu1  ;;  %v2043_v16 = vsel %vm4624_vm3, %v2042_v6, %v2038_v13  ;;  %vm2097_vm6 = vmor %vm2095_vm4, %vm2096_vm5  ;;  %v1128_v42 = vperm.slane %v4616_v8, 2  ;;  %v3781_v0 = vld [vmem:[#allocation12 + $0xd0] sm:$0xff] }
 0x1f3   : > { %v2092_v10 = vsub.f32 1.0, %v2091_v2  ;;  %v2150_v55 = vmul.f32 %v2043_v16, %v4572_v33 }
 0x1f4   : > { %v1882_v11 = vadd.f32 %v1881_v4, %v1868_v3  ;;  %v1856_v57 = vadd.f32 %v1855_v62, %v1842_v14 }
 0x1f5   : > { %v2093_v51 = vmul.f32 %v3913_v63, %v2092_v10  ;;  %2454 = vmatpush.bf16.msra.mxu2 %v3774_v59 }
 0x1f6   : > { %v3419_v15 = vmul.f32 -1.442695, %v1882_v11 }
 0x1f7   : > { %v2094_v18 = vadd.f32 %v3913_v63, %v2093_v51 }
 0x1f8   : > { %3914 = vpow2.f32 %v3419_v15 }
 0x1f9   : > { %v1869_v20 = vpop.f32.mrf.mxu2  ;;  %v2098_v23 = vsel %vm2097_vm6, %v3913_v63, %v2094_v18  ;;  %2455 = vmatpush.bf16.msra.mxu2 %v3773_v9 }
 0x1fa   : > { %v1870_v21 = vadd.f32 %v1869_v20, %v1856_v57  ;;  %v1883_v22 = vpop.f32.mrf.mxu3  ;;  %v2103_v58 = vsel %vm2100_vm7, %v2102_v17, %v2098_v23  ;;  %v3772_v17 = vld [vmem:[#allocation12 + $0x88] sm:$0xff] }
 0x1fb   : > { %v2154_v25 = vmul.f32 %v2103_v58, %v4574_v36  ;;  %v3771_v58 = vld [vmem:[#allocation12 + $0x80] sm:$0xff] }
 0x1fc   : > { %v1884_v24 = vadd.f32 %v1883_v22, %v1870_v21 }
 0x1fd   : > { %v2158_v30 = vpack.c.bf16 %v2154_v25, %v2150_v55  ;;  %2456 = vmatpush.bf16.msra.mxu2 %v3772_v17 }
 0x1fe   : > { %v3915_v28 = vpop.eup %3914  ;;  %v3423_v29 = vmul.f32 -1.442695, %v1884_v24 }
 0x1ff   : > { %v2023_v34 = vadd.f32 1.0, %v3915_v28  ;;  %2430 = vmatmul.bf16.vlgmr.msra.gmra.mxu0 %v2158_v30 }
 0x200   : > { %3916 = vpow2.f32 %v3423_v29 }
 0x201   : > { %3918 = vrcp.f32 %v2023_v34  ;;  %vm2050_vm8 = vweird.f32 %v2023_v34  ;;  %v2054_v52 = vand.u32 2147483647, %v2023_v34  ;;  %v2056_v54 = vand.u32 2147483648, %v2023_v34  ;;  %2457 = vmatpush.bf16.msra.mxu2 %v3771_v58 }
 0x203   : > { %vm4640_vm11 = vcmp.eq.f32.partialorder %v2054_v52, 8.507059e+37  ;;  %v2057_v5 = vor.u32 1.1754944e-38, %v2056_v54 }
 0x206   : > { %v3917_v33 = vpop.eup %3916 }
 0x207   : > { %v3919_v40 = vpop.eup %3918  ;;  %v2027_v41 = vadd.f32 1.0, %v3917_v33 }
 0x208   : > { %v2046_v36 = vmul.f32 %v3919_v40, %v2023_v34  ;;  %vm2051_vm9 = vweird.f32 %v3919_v40  ;;  %v3785_v34 = vld [vmem:[#allocation12 + $0xf0] sm:$0xff] }
 0x209   : > { %3920 = vrcp.f32 %v2027_v41  ;;  %v1895_v45 = vpop.f32.mrf.mxu0  ;;  %vm4636_vm10 = vmor %vm2050_vm8, %vm2051_vm9  ;;  %vm2110_vm12 = vweird.f32 %v2027_v41  ;;  %v2114_v6 = vand.u32 2147483647, %v2027_v41  ;;  %v2116_v7 = vand.u32 2147483648, %v2027_v41  ;;  %2465 = vmatpush.bf16.msra.mxu3 %v3785_v34 }
 0x20a   : > { %v2047_v44 = vsub.f32 1.0, %v2046_v36  ;;  %v1896_v46 = vadd.f32 %v1895_v45, %v1128_v42  ;;  %v1909_v47 = vpop.f32.mrf.mxu1 }
 0x20b   : > { %v2117_v16 = vor.u32 1.1754944e-38, %v2116_v7  ;;  %vm2115_vm15 = vcmp.eq.f32.partialorder %v2114_v6, 8.507059e+37 }
 0x20c   : > { %v2048_v50 = vmul.f32 %v3919_v40, %v2047_v44  ;;  %v1910_v53 = vadd.f32 %v1909_v47, %v1896_v46  ;;  %v3782_v47 = vld [vmem:[#allocation12 + $0xd8] sm:$0xff] }
 0x20d   : > { %2466 = vmatpush.bf16.msra.mxu3 %v3784_v35 }
 0x20e   : > { %v2049_v60 = vadd.f32 %v3919_v40, %v2048_v50 }
 0x20f   : > { %v3921_v61 = vpop.eup %3920 }
 0x210   : > { %v2106_v1 = vmul.f32 %v3921_v61, %v2027_v41  ;;  %v2053_v13 = vsel %vm4636_vm10, %v3919_v40, %v2049_v60  ;;  %vm2111_vm13 = vweird.f32 %v3921_v61 }
 0x211   : > { %v1923_v63 = vpop.f32.mrf.mxu2  ;;  %v1897_v12 = vpop.f32.mrf.mxu0  ;;  %v2058_v57 = vsel %vm4640_vm11, %v2057_v5, %v2053_v13  ;;  %vm2112_vm14 = vmor %vm2110_vm12, %vm2111_vm13  ;;  %v3780_v5 = vld [vmem:[#allocation12 + $0xc8] sm:$0xff] }
 0x212   : > { %v1924_v2 = vadd.f32 %v1923_v63, %v1910_v53  ;;  %v1937_v3 = vpop.f32.mrf.mxu3  ;;  %v2107_v10 = vsub.f32 1.0, %v2106_v1  ;;  %v1898_v56 = vadd.f32 %v1897_v12, %v1128_v42  ;;  %v1911_v14 = vpop.f32.mrf.mxu1  ;;  %v2151_v23 = vmul.f32 %v2058_v57, %v4580_v48  ;;  %v3783_v42 = vld [vmem:[#allocation12 + $0xe0] sm:$0xff] }
 0x213   : > { %v1129_v48 = vperm.slane %v4616_v8, 3  ;;  %2467 = vmatpush.bf16.msra.mxu3 %v3783_v42 }
 0x214   : > { %v1938_v11 = vadd.f32 %v1937_v3, %v1924_v2  ;;  %v2108_v62 = vmul.f32 %v3921_v61, %v2107_v10  ;;  %v1912_v15 = vadd.f32 %v1911_v14, %v1898_v56 }
 0x216   : > { %v3420_v51 = vmul.f32 -1.442695, %v1938_v11  ;;  %v2109_v18 = vadd.f32 %v3921_v61, %v2108_v62 }
 0x217   : > { %2468 = vmatpush.bf16.msra.mxu3 %v3782_v47 }
 0x218   : > { %3922 = vpow2.f32 %v3420_v51  ;;  %v2113_v22 = vsel %vm2112_vm14, %v3921_v61, %v2109_v18  ;;  %v3779_v51 = vld [vmem:[#allocation12 + $0xc0] sm:$0xff] }
 0x219   : > { %v1925_v19 = vpop.f32.mrf.mxu2  ;;  %v2118_v55 = vsel %vm2115_vm15, %v2117_v16, %v2113_v22 }
 0x21a   : > { %v1926_v20 = vadd.f32 %v1925_v19, %v1912_v15  ;;  %v1939_v21 = vpop.f32.mrf.mxu3  ;;  %v2155_v25 = vmul.f32 %v2118_v55, %v4582_v49 }
 0x21b   : > { %2469 = vmatpush.bf16.msra.mxu3 %v3781_v0 }
 0x21c   : > { %v1940_v24 = vadd.f32 %v1939_v21, %v1926_v20  ;;  %v2159_v29 = vpack.c.bf16 %v2155_v25, %v2151_v23 }
 0x21e   : > { %v3923_v27 = vpop.eup %3922  ;;  %v3424_v28 = vmul.f32 -1.442695, %v1940_v24  ;;  %2444 = vmatmul.bf16.vlgmr.msra.gmra.mxu1 %v2159_v29 }
 0x21f   : > { %v2024_v30 = vadd.f32 1.0, %v3923_v27  ;;  %2470 = vmatpush.bf16.msra.mxu3 %v3780_v5 }
 0x220   : > { %3924 = vpow2.f32 %v3424_v28 }
 0x221   : > { %3926 = vrcp.f32 %v2024_v30  ;;  %vm2065_vm0 = vweird.f32 %v2024_v30  ;;  %v2069_v52 = vand.u32 2147483647, %v2024_v30  ;;  %v2071_v53 = vand.u32 2147483648, %v2024_v30 }
 0x223   : > { %vm4656_vm3 = vcmp.eq.f32.partialorder %v2069_v52, 8.507059e+37  ;;  %v2072_v7 = vor.u32 1.1754944e-38, %v2071_v53  ;;  %2471 = vmatpush.bf16.msra.mxu3 %v3779_v51 }
 0x226   : > { %v3925_v39 = vpop.eup %3924 }
 0x227   : > { %v3927_v33 = vpop.eup %3926  ;;  %v2028_v40 = vadd.f32 1.0, %v3925_v39 }
 0x228   : > { %v2061_v49 = vmul.f32 %v3927_v33, %v2024_v30  ;;  %vm2066_vm1 = vweird.f32 %v3927_v33 }
 0x229   : > { %v1951_v41 = vpop.f32.mrf.mxu0  ;;  %3928 = vrcp.f32 %v2028_v40  ;;  %vm4652_vm2 = vmor %vm2065_vm0, %vm2066_vm1  ;;  %v2129_v9 = vand.u32 2147483647, %v2028_v40  ;;  %v2131_v10 = vand.u32 2147483648, %v2028_v40  ;;  %vm2125_vm5 = vweird.f32 %v2028_v40 }
 0x22a   : > { %v1952_v36 = vadd.f32 %v1951_v41, %v1129_v48  ;;  %v2062_v43 = vsub.f32 1.0, %v2061_v49  ;;  %v1965_v44 = vpop.f32.mrf.mxu1 }
 0x22b   : > { %v2132_v16 = vor.u32 1.1754944e-38, %v2131_v10  ;;  %vm2130_vm7 = vcmp.eq.f32.partialorder %v2129_v9, 8.507059e+37 }
 0x22c   : > { %v2063_v45 = vmul.f32 %v3927_v33, %v2062_v43  ;;  %v1966_v46 = vadd.f32 %v1965_v44, %v1952_v36 }
 0x22e   : > { %v2064_v63 = vadd.f32 %v3927_v33, %v2063_v45 }
 0x22f   : > { %v3929_v50 = vpop.eup %3928 }
 0x230   : > { %v2121_v54 = vmul.f32 %v3929_v50, %v2028_v40  ;;  %v2068_v13 = vsel %vm4652_vm2, %v3927_v33, %v2064_v63  ;;  %vm2126_vm4 = vweird.f32 %v3929_v50 }
 0x231   : > { %v1979_v8 = vpop.f32.mrf.mxu2  ;;  %v1953_v61 = vpop.f32.mrf.mxu0  ;;  %v2073_v57 = vsel %vm4656_vm3, %v2072_v7, %v2068_v13  ;;  %vm2127_vm6 = vmor %vm2125_vm5, %vm2126_vm4 }
 0x232   : > { %v1980_v59 = vadd.f32 %v1979_v8, %v1966_v46  ;;  %v1993_v60 = vpop.f32.mrf.mxu3  ;;  %v2122_v2 = vsub.f32 1.0, %v2121_v54  ;;  %v1954_v4 = vadd.f32 %v1953_v61, %v1129_v48  ;;  %v1967_v56 = vpop.f32.mrf.mxu1  ;;  %v2152_v22 = vmul.f32 %v2073_v57, %v4568_v31  ;;  %v3905_v54 = vld [vmem:[%s4699_s6] ss:$0 sm:$0xff] }
 0x234   : > { %v1994_v3 = vadd.f32 %v1993_v60, %v1980_v59  ;;  %v2123_v11 = vmul.f32 %v3929_v50, %v2122_v2  ;;  %v1968_v14 = vadd.f32 %v1967_v56, %v1954_v4 }
 0x236   : > { %v3421_v12 = vmul.f32 -1.442695, %v1994_v3  ;;  %v2124_v62 = vadd.f32 %v3929_v50, %v2123_v11 }
 0x238   : > { %3930 = vpow2.f32 %v3421_v12  ;;  %v2128_v18 = vsel %vm2127_vm6, %v3929_v50, %v2124_v62 }
 0x239   : > { %v1981_v15 = vpop.f32.mrf.mxu2  ;;  %v2133_v20 = vsel %vm2130_vm7, %v2132_v16, %v2128_v18 }
 0x23a   : > { %v1982_v17 = vadd.f32 %v1981_v15, %v1968_v14  ;;  %v1995_v19 = vpop.f32.mrf.mxu3  ;;  %v2156_v23 = vmul.f32 %v2133_v20, %v4570_v32 }
 0x23c   : > { %v1996_v21 = vadd.f32 %v1995_v19, %v1982_v17  ;;  %v2160_v24 = vpack.c.bf16 %v2156_v23, %v2152_v22 }
 0x23e   : > { %v3931_v55 = vpop.eup %3930  ;;  %v3425_v58 = vmul.f32 -1.442695, %v1996_v21  ;;  %2458 = vmatmul.bf16.vlgmr.msra.gmra.mxu2 %v2160_v24 }
 0x23f   : > { %v2025_v25 = vadd.f32 1.0, %v3931_v55 }
 0x240   : > { %3932 = vpow2.f32 %v3425_v58 }
 0x241   : > { %3934 = vrcp.f32 %v2025_v25  ;;  %v2086_v32 = vand.u32 2147483648, %v2025_v25  ;;  %vm2080_vm9 = vweird.f32 %v2025_v25  ;;  %v2084_v33 = vand.u32 2147483647, %v2025_v25 }
 0x243   : > { %v2087_v36 = vor.u32 1.1754944e-38, %v2086_v32  ;;  %vm2085_vm13 = vcmp.eq.f32.partialorder %v2084_v33, 8.507059e+37 }
 0x246   : > { %v3933_v26 = vpop.eup %3932 }
 0x247   : > { %v3935_v27 = vpop.eup %3934  ;;  %v2029_v28 = vadd.f32 1.0, %v3933_v26 }
 0x248   : > { %v2076_v29 = vmul.f32 %v3935_v27, %v2025_v25  ;;  %vm2081_vm8 = vweird.f32 %v3935_v27 }
 0x249   : > { %3936 = vrcp.f32 %v2029_v28  ;;  %vm2082_vm10 = vmor %vm2080_vm9, %vm2081_vm8  ;;  %v2146_v40 = vand.u32 2147483648, %v2029_v28  ;;  %v2144_v42 = vand.u32 2147483647, %v2029_v28  ;;  %vm2140_vm12 = vweird.f32 %v2029_v28 }
 0x24a   : > { %v2077_v30 = vsub.f32 1.0, %v2076_v29 }
 0x24b   : > { %v2147_v45 = vor.u32 1.1754944e-38, %v2146_v40  ;;  %vm2145_vm15 = vcmp.eq.f32.partialorder %v2144_v42, 8.507059e+37 }
 0x24c   : > { %v2078_v34 = vmul.f32 %v3935_v27, %v2077_v30 }
 0x24e   : > { %v2079_v31 = vadd.f32 %v3935_v27, %v2078_v34 }
 0x24f   : > { %v3937_v35 = vpop.eup %3936 }
 0x250   : > { %v2136_v48 = vmul.f32 %v3937_v35, %v2029_v28  ;;  %v2083_v41 = vsel %vm2082_vm10, %v3935_v27, %v2079_v31  ;;  %vm2141_vm11 = vweird.f32 %v3937_v35 }
 0x251   : > { %v2088_v44 = vsel %vm2085_vm13, %v2087_v36, %v2083_v41  ;;  %vm2142_vm14 = vmor %vm2140_vm12, %vm2141_vm11 }
 0x252   : > { %v2137_v39 = vsub.f32 1.0, %v2136_v48  ;;  %v2153_v50 = vmul.f32 %v2088_v44, %v4576_v37 }
 0x254   : > { %v2138_v49 = vmul.f32 %v3937_v35, %v2137_v39 }
 0x256   : > { %v2139_v43 = vadd.f32 %v3937_v35, %v2138_v49 }
 0x258   : > { %v2143_v46 = vsel %vm2142_vm14, %v3937_v35, %v2139_v43 }
 0x259   : > { %v2148_v47 = vsel %vm2145_vm15, %v2147_v45, %v2143_v46 }
 0x25a   : > { %v2157_v8 = vmul.f32 %v2148_v47, %v4578_v38 }
 0x25c   : > { %v2161_v52 = vpack.c.bf16 %v2157_v8, %v2153_v50 }
 0x25e   : > { %2472 = vmatmul.bf16.vlgmr.msra.gmra.mxu3 %v2161_v52 }
 0x27c   : > { %v2431_v53 = vpop.f32.mrf.mxu0 }
 0x27d   : > { %v2432_v61 = vadd.f32 %v3905_v54, %v2431_v53 }
 0x284   : > { %v2433_v1 = vpop.f32.mrf.mxu0 }
 0x285   : > { %v2434_v5 = vadd.f32 %v3905_v54, %v2433_v1 }
 0x29b   : > { %v2445_v59 = vpop.f32.mrf.mxu1 }
 0x29c   : > { %v2446_v63 = vadd.f32 %v2445_v59, %v2432_v61 }
 0x2a3   : > { %v2447_v4 = vpop.f32.mrf.mxu1 }
 0x2a4   : > { %v2448_v38 = vadd.f32 %v2447_v4, %v2434_v5 }
 0x2c1   : > { %v2459_v60 = vpop.f32.mrf.mxu2 }
 0x2c2   : > { %v2460_v0 = vadd.f32 %v2459_v60, %v2446_v63 }
 0x2c9   : > { %v2461_v37 = vpop.f32.mrf.mxu2 }
 0x2ca   : > { %v2462_v6 = vadd.f32 %v2461_v37, %v2448_v38 }
 0x2e1   : > { %v2473_v2 = vpop.f32.mrf.mxu3 }
 0x2e2   : > { %v2474_v3 = vadd.f32 %v2473_v2, %v2460_v0 }
 0x2e4   : > { %2478 = vst [vmem:[#allocation14] sm:$0xff] %v2474_v3 }
 0x2e9   : > { %v2475_v7 = vpop.f32.mrf.mxu3 }
 0x2ea   : > { %v2476_v9 = vadd.f32 %v2475_v7, %v2462_v6 }
 0x2ec   : > { %2479 = vst [vmem:[#allocation14 + $0x8] sm:$0xff] %v2476_v9 }
 0x2ed PF: > { %p3840_p3 = scmp.eq.s32.totalorder %s4302_s30, 3  ;;  %s2490_s14 = sshll.u32 %s4700_s7, 4  ;;  %s2491_s14 = int_to_ptr.hbm [resolvable:$true] %s2490_s14 }
 0x2ee   : > { %s4230_s20 = smov [#allocation14]   ;;  %s4231_s24 = smov 128  }
 0x2ef   : > { %s2488_s11 = sshll.u32 %s4230_s20, 4  ;;  %s4232_s13 = smov 8   ;;  %s2489_s11 = int_to_ptr.vmem [resolvable:$true] %s2488_s11 }
 0x2f0   : > { %3808 = dma.vmem_to_hbm [thread:$0]  (%p3840_p3), %s2489_s11, 256, %s2491_s14, [#allocation5], %s4231_s24, %s4231_s24, %s4232_s13  }
 0x2f1   : > { %4191 = dma.done.wait (%p3840_p3), [#allocation5], 256  }
 0x2f2   : > { %4193 = vsyncadd (%p3840_p3), [#allocation5], 4294967040 }
 0x2f3 PF: > { %s26_s29 = sadd.s32 1, %s4216_s29   ;;  %s4735_s30 = sld [smem:[#allocation22_spill]] }
 0x2f4   : > { %p23_p4 = scmp.ge.s32.totalorder %s26_s29, 6   ;;  %s4736_s18 = sld [smem:[#allocation21_spill]] }
 0x2f5   : > { %s4737_s24 = smov %s4200_s25  ;;  %s4738_s25 = smov %s4204_s26 }
 0x2f6   : > { %s4740_s27 = smov %s4212_s28  ;;  %25 = sbr.rel (!%p23_p4) target bundleno = 15 (0xf), region = 123 }
 0x2f9   : > { %s4739_s26 = smov %s4735_s30 }
 0x2fa   : > { %s4741_s28 = smov %s4736_s18 }
 0x2fb   :  { %2507 = vsyncpa [#allocation4], 1 }
 0x2fc   :  { %2509 = vsyncpa [#allocation4 + $0x1], 1 }
 0x2fd   :  { %2510 = vsyncpa [#allocation7], 1 }
 0x2fe   :  { %2512 = vsyncpa [#allocation7 + $0x1], 1 }
 0x2ff   :  { %2513 = vsyncpa [#allocation10], 1 }
 0x300   :  { %2514 = vsyncpa [#allocation13], 1 }
 0x301   :  { %2515 = vsyncpa [#allocation5], 1 }
 0x302   :  { %2517 = vsyncpa [#allocation5 + $0x1], 1 }

</bundles_post_ra>
